<compile_context>
chip_gen: v5e
topology: v5e:2x2
jax: 0.10.0
libtpu: 0.0.40
codegen_flags: <defaults>
</compile_context>

<pallas_src>
import jax
import jax.numpy as jnp
from jax.experimental import pallas as pl
from jax.experimental.pallas import tpu as pltpu

# ---- small, self-consistent configuration (mirrors the module's hparams) ----
BATCH = 2
ENTITY_SIZE = 8          # number of entities
EMBED_SIZE = 32          # AHP.entity_embedding_size
AR_SIZE = 32             # AHP.autoregressive_embedding_size
H256 = 32                # AHP.original_256 (scaled down)
H32 = 16                 # AHP.original_32  (scaled down) -> LSTM hidden size
MAX_UNIT_TYPES = 16      # SCHP.max_unit_type (scaled down)
MAX_SELECTED = 4         # AHP.max_selected (scaled down)
NUM_ACTIONS = 10
TEMPERATURE = 1.0        # is_sl_training=True -> temperature == 1.0
LANES = 128              # lane-dense slab width

# ---- single parameter-slab row offsets (all matrices start at lane 0) -------
_R_WF = 0
_R_W1 = _R_WF + MAX_UNIT_TYPES
_R_WP = _R_W1 + AR_SIZE
_R_WFUSED = _R_WP + H32
_R_WCONV = _R_WFUSED + H32
_R_W2 = _R_WCONV + EMBED_SIZE
_R_WIH = _R_W2 + H256
_R_WHH = _R_WIH + H32
_R_BF = _R_WHH + H32
_R_B1 = _R_BF + 1
_R_BP = _R_B1 + 1
_R_BFUSED = _R_BP + 1
_R_B2 = _R_BFUSED + 1
_R_BLSTM = _R_B2 + 1
_PROWS = _R_BLSTM + 1

# ---- single data-slab lane offsets ------------------------------------------
_C_ENT = 0
_C_AR = _C_ENT + EMBED_SIZE
_C_OH = _C_AR + AR_SIZE
_C_UNIF = _C_OH + MAX_UNIT_TYPES
_C_SEL = _C_UNIF + MAX_SELECTED          # = 84, fits in 128 lanes

# ---- single output-slab lane offsets ----------------------------------------
_O_LOGITS = 0
_O_AR = _O_LOGITS + MAX_SELECTED * ENTITY_SIZE
_O_UNITS = _O_AR + AR_SIZE


def selected_units_kernel(data_ref, param_ref, out_ref):
    f32 = jnp.float32
    B, E, H, MS = BATCH, ENTITY_SIZE, H32, MAX_SELECTED

    # ---- unpack the single parameter slab (static row slices, lane 0) -------
    wf     = param_ref[_R_WF:_R_WF + MAX_UNIT_TYPES, 0:H256]
    w1     = param_ref[_R_W1:_R_W1 + AR_SIZE, 0:H256]
    wp     = param_ref[_R_WP:_R_WP + H32, 0:AR_SIZE]
    wfused = param_ref[_R_WFUSED:_R_WFUSED + H32, 0:H256]      # Wp @ W1
    wconv  = param_ref[_R_WCONV:_R_WCONV + EMBED_SIZE, 0:H32]
    w2     = param_ref[_R_W2:_R_W2 + H256, 0:H32]
    wih    = param_ref[_R_WIH:_R_WIH + H32, 0:4 * H32]          # gates (i,f,o,g)
    whh    = param_ref[_R_WHH:_R_WHH + H32, 0:4 * H32]
    bf     = param_ref[_R_BF:_R_BF + 1, 0:H256]
    b1     = param_ref[_R_B1:_R_B1 + 1, 0:H256]
    bp     = param_ref[_R_BP:_R_BP + 1, 0:AR_SIZE]
    bfused = param_ref[_R_BFUSED:_R_BFUSED + 1, 0:H256]         # bp @ W1
    b2     = param_ref[_R_B2:_R_B2 + 1, 0:H32]
    blstm  = param_ref[_R_BLSTM:_R_BLSTM + 1, 0:4 * H32]        # bih + bhh

    # ---- unpack the single data slab -----------------------------------------
    ent_flat      = data_ref[:, _C_ENT:_C_ENT + EMBED_SIZE]      # [B*E, D]
    ar0           = data_ref[0:B, _C_AR:_C_AR + AR_SIZE]
    one_hot_types = data_ref[0:B, _C_OH:_C_OH + MAX_UNIT_TYPES]
    unif          = data_ref[0:B, _C_UNIF:_C_UNIF + MAX_SELECTED]
    sel           = data_ref[0:B, _C_SEL:_C_SEL + 1]

    # the_func_embed = relu(func_embed(unit_types_one_hot))
    func_embed = jnp.maximum(
        jnp.dot(one_hot_types, wf, preferred_element_type=f32) + bf, 0.0)

    # key = conv_1(entity.transpose(-1,-2)).transpose(-1,-2); k=1 conv == matmul
    key = jnp.dot(ent_flat, wconv, preferred_element_type=f32).reshape(B, E, H)

    # hoisted constants for inverse-CDF sampling / output bookkeeping
    tri = (jax.lax.broadcasted_iota(jnp.int32, (E, E), 1)       # tri[e,j]=1 if j<=e
           <= jax.lax.broadcasted_iota(jnp.int32, (E, E), 0)).astype(f32)
    ent_iota = jax.lax.broadcasted_iota(jnp.int32, (B, E), 1)
    ms_iota = jax.lax.broadcasted_iota(jnp.int32, (B, MS), 1)

    mask = jnp.ones((B, E), f32)
    c = jnp.zeros((B, H), f32)
    h_part = jnp.zeros((B, 4 * H), f32) + blstm                 # h@Whh + b for h == 0
    # x = func_embed + fc_1(ar); maintained incrementally (W1 applied once)
    x = func_embed + jnp.dot(ar0, w1, preferred_element_type=f32) + b1
    out_sum = jnp.zeros((B, H), f32)
    units_acc = jnp.zeros((B, MS), jnp.int32)
    logits_pieces = []

    # NOTE: at real AlphaStar sizes this unrolled Python loop should become
    # lax.fori_loop(..., unroll=k) with a VMEM scratch for the stacked logits.
    for i in range(MS):
        # z_2 = relu(fc_2(func_embed + fc_1(ar)))
        z2 = jnp.maximum(jnp.dot(x, w2, preferred_element_type=f32) + b2, 0.0)

        # single-step LSTM cell; the h-recurrence matmul for THIS step was
        # already issued last step as h_part (hides under the sampling chain)
        gates = jnp.dot(z2, wih, preferred_element_type=f32) + h_part
        sig = jax.nn.sigmoid(gates[:, 0:3 * H])                 # i, f, o in one shot
        g_g = jnp.tanh(gates[:, 3 * H:4 * H])
        i_g = sig[:, 0:H]
        f_g = sig[:, H:2 * H]
        o_g = sig[:, 2 * H:3 * H]
        c = f_g * c + i_g * g_g
        h = o_g * jnp.tanh(c)                                   # query
        if i + 1 < MS:
            # next step's recurrent term: independent of everything below, so
            # the compiler can overlap its MXU round-trip with the sampling chain
            h_part = jnp.dot(h, whh, preferred_element_type=f32) + blstm

        # y = bmm(key, query^T).squeeze(-1); multiplicative mask exactly as source
        y = jnp.sum(key * h[:, None, :], axis=-1)               # [B, E]
        logits = (y * mask) * (1.0 / TEMPERATURE)
        logits_pieces.append(logits)

        # torch.multinomial(softmax(logits), 1) via inverse CDF on the
        # unnormalized exp: compare prefix-sum(exp) < u * total (no divide,
        # no MXU matmul -- VPU mul + XLU lane reduce only).
        # TODO(synk): PyTorch RNG stream cannot be reproduced; uses externally
        #             supplied uniforms (same distribution).
        ex = jnp.exp(logits - jnp.max(logits, axis=-1, keepdims=True))
        total = jnp.sum(ex, axis=-1, keepdims=True)
        prefix = jnp.sum(tri[None, :, :] * ex[:, None, :], axis=-1)   # [B, E]
        thresh = unif[:, i:i + 1] * total
        entity_id = jnp.clip(
            jnp.sum((prefix < thresh).astype(jnp.int32), axis=-1, keepdims=True),
            0, E - 1)                                            # [B, 1] int32
        units_acc = jnp.where(ms_iota == i, entity_id, units_acc)
        one_hot = (ent_iota == entity_id).astype(f32)            # [B, E]

        # out = bmm(one_hot, key).squeeze(-2) - mean(one_hot); mean == 1/E exactly
        out = jnp.sum(key * one_hot[:, :, None], axis=1) - (1.0 / E)
        out_sum = out_sum + out

        if i + 1 < MS:                                           # skip dead work on last step
            mask = mask * (1.0 - one_hot)                        # mask[selected] = 0
            # incremental fc_1: x_{i+1} = x_i + (out@Wp + bp)@W1 = x_i + out@Wfused + bfused
            x = x + jnp.dot(out, wfused, preferred_element_type=f32) + bfused

    # project() hoisted out of the loop:
    # ar_out = ar + Σ_i (out_i @ Wp + bp) = ar + (Σ out_i) @ Wp + MS * bp
    ar_out = (ar0 + jnp.dot(out_sum, wp, preferred_element_type=f32)
              + float(MS) * bp)

    # ONE lane-dense [B, 128] store; select_unit_mask applied in-register
    pad = jnp.zeros((B, LANES - MS * E - AR_SIZE - MS), f32)
    out_ref[...] = jnp.concatenate(
        [p * sel for p in logits_pieces]
        + [ar_out * sel, units_acc.astype(f32) * sel, pad], axis=-1)


def selected_units_head(ar, one_hot_types, ent, unif, sel_mask, params):
    f32 = jnp.float32
    B = ar.shape[0]
    H = H32

    # ---- one-time, parameter-only fusions done in plain JAX ----
    # reorder LSTM gate columns from PyTorch (i, f, g, o) to (i, f, o, g)
    def reorder(w):
        return jnp.concatenate(
            [w[:, 0:2 * H], w[:, 3 * H:4 * H], w[:, 2 * H:3 * H]], axis=-1)

    wih_r = reorder(params['wih'])
    whh_r = reorder(params['whh'])
    b_lstm = reorder(params['bih']) + reorder(params['bhh'])
    w_fused = params['wp'] @ params['w1']          # project -> fc_1 chain
    b_fused = params['bp'] @ params['w1']

    # ---- pack ALL parameters into ONE lane-dense [rows, 128] f32 slab ----
    def pad_lanes(m):
        m = m.astype(f32)
        return jnp.pad(m, ((0, 0), (0, LANES - m.shape[1])))

    pslab = jnp.concatenate([pad_lanes(m) for m in (
        params['wf'], params['w1'], params['wp'], w_fused,
        params['wconv'], params['w2'], wih_r, whh_r,
        params['bf'], params['b1'], params['bp'], b_fused,
        params['b2'], b_lstm)], axis=0)
    assert pslab.shape == (_PROWS, LANES)

    # ---- pack entity_embeddings (pre-flattened) + ar + misc into ONE data slab
    ent_flat = ent.reshape(B * ENTITY_SIZE, EMBED_SIZE).astype(f32)
    right = jnp.concatenate([ar.astype(f32), one_hot_types.astype(f32),
                             unif.astype(f32), sel_mask.astype(f32)], axis=-1)
    right = jnp.pad(right, ((0, B * ENTITY_SIZE - B),
                            (0, LANES - EMBED_SIZE - right.shape[1])))
    dslab = jnp.concatenate([ent_flat, right], axis=-1)          # [B*E, 128]

    vmem = lambda: pl.BlockSpec(memory_space=pltpu.MemorySpace.VMEM)
    # NOTE(v7x): with many independent batches, add a leading grid axis over
    # batch groups + dimension_semantics=("parallel",) to use the second TC;
    # pointless at B=2.
    out = pl.pallas_call(
        selected_units_kernel,
        out_shape=jax.ShapeDtypeStruct((B, LANES), f32),          # one lane-dense slab
        in_specs=[vmem(), vmem()],
        out_specs=vmem(),
    )(dslab, pslab)

    units_logits = out[:, _O_LOGITS:_O_LOGITS + MAX_SELECTED * ENTITY_SIZE
                       ].reshape(B, MAX_SELECTED, ENTITY_SIZE)
    ar_out = out[:, _O_AR:_O_AR + AR_SIZE]
    # unit ids are small exact integers in f32; cast back losslessly
    units = out[:, _O_UNITS:_O_UNITS + MAX_SELECTED
                ].astype(jnp.int32).reshape(B, MAX_SELECTED, 1)
    return units_logits, units, ar_out


if __name__ == "__main__":
    key = jax.random.PRNGKey(0)
    ks = jax.random.split(key, 20)

    # inputs
    ar = jax.random.normal(ks[0], (BATCH, AR_SIZE), jnp.float32)
    action_type = jax.random.randint(ks[1], (BATCH, 1), 0, NUM_ACTIONS)
    ent = jax.random.normal(ks[2], (BATCH, ENTITY_SIZE, EMBED_SIZE), jnp.float32)

    # deterministic synthetic lookup tables standing in for SC2 game metadata
    # (L.action_can_apply_to_entity_types_mask / L.action_involve_selecting_units_mask)
    can_apply_table = (jax.random.uniform(ks[3], (NUM_ACTIONS, MAX_UNIT_TYPES)) > 0.5
                       ).astype(jnp.float32)
    involve_table = (jax.random.uniform(ks[4], (NUM_ACTIONS, 1)) > 0.3
                     ).astype(jnp.float32)
    one_hot_types = can_apply_table[action_type[:, 0]]          # [B, MAX_UNIT_TYPES]
    sel_mask = involve_table[action_type[:, 0]]                 # [B, 1]

    # uniforms driving the categorical (multinomial) sampling inside the kernel
    unif = jax.random.uniform(ks[5], (BATCH, MAX_SELECTED), jnp.float32)

    def init(k, shape, scale=0.1):
        return scale * jax.random.normal(k, shape, jnp.float32)

    params = dict(
        wf=init(ks[6], (MAX_UNIT_TYPES, H256)),  bf=init(ks[7], (1, H256)),
        wconv=init(ks[8], (EMBED_SIZE, H32)),                      # Conv1d k=1, no bias
        w1=init(ks[9], (AR_SIZE, H256)),         b1=init(ks[10], (1, H256)),
        w2=init(ks[11], (H256, H32)),            b2=init(ks[12], (1, H32)),
        wih=init(ks[13], (H32, 4 * H32)),        whh=init(ks[14], (H32, 4 * H32)),
        bih=init(ks[15], (1, 4 * H32)),          bhh=init(ks[16], (1, 4 * H32)),
        wp=init(ks[17], (H32, AR_SIZE)),         bp=init(ks[18], (1, AR_SIZE)),
    )

    units_logits, units, ar_out = selected_units_head(
        ar, one_hot_types, ent, unif, sel_mask, params)
    jax.block_until_ready((units_logits, units, ar_out))

    assert units_logits.shape == (BATCH, MAX_SELECTED, ENTITY_SIZE)
    assert units.shape == (BATCH, MAX_SELECTED, 1)
    assert ar_out.shape == (BATCH, AR_SIZE)
    assert bool(jnp.all(jnp.isfinite(units_logits)))
    assert bool(jnp.all(jnp.isfinite(ar_out)))
    assert bool(jnp.all((units >= 0) & (units < ENTITY_SIZE)))
    print("KERNEL_OK")
</pallas_src>

<mosaic_0001>
module attributes {stable_mosaic.version = 11 : i64} {
  func.func @selected_units_kernel(%arg0: memref<16x128xf32, #tpu.memory_space<vmem>>, %arg1: memref<182x128xf32, #tpu.memory_space<vmem>>, %arg2: memref<2x128xf32, #tpu.memory_space<vmem>>) attributes {dimension_semantics = [], scalar_prefetch = 0 : i64, scratch_operands = 0 : i64, tpu.core_type = #tpu.core_type<tc>} {
    %c0 = arith.constant 0 : index
    %c0_0 = arith.constant 0 : index
    %0 = vector.load %arg1[%c0, %c0_0] : memref<182x128xf32, #tpu.memory_space<vmem>>, vector<16x32xf32>
    %c16 = arith.constant 16 : index
    %c0_1 = arith.constant 0 : index
    %1 = vector.load %arg1[%c16, %c0_1] : memref<182x128xf32, #tpu.memory_space<vmem>>, vector<32x32xf32>
    %c48 = arith.constant 48 : index
    %c0_2 = arith.constant 0 : index
    %2 = vector.load %arg1[%c48, %c0_2] : memref<182x128xf32, #tpu.memory_space<vmem>>, vector<16x32xf32>
    %c64 = arith.constant 64 : index
    %c0_3 = arith.constant 0 : index
    %3 = vector.load %arg1[%c64, %c0_3] : memref<182x128xf32, #tpu.memory_space<vmem>>, vector<16x32xf32>
    %c80 = arith.constant 80 : index
    %c0_4 = arith.constant 0 : index
    %4 = vector.load %arg1[%c80, %c0_4] : memref<182x128xf32, #tpu.memory_space<vmem>>, vector<32x16xf32>
    %c112 = arith.constant 112 : index
    %c0_5 = arith.constant 0 : index
    %5 = vector.load %arg1[%c112, %c0_5] : memref<182x128xf32, #tpu.memory_space<vmem>>, vector<32x16xf32>
    %c144 = arith.constant 144 : index
    %c0_6 = arith.constant 0 : index
    %6 = vector.load %arg1[%c144, %c0_6] : memref<182x128xf32, #tpu.memory_space<vmem>>, vector<16x64xf32>
    %c160 = arith.constant 160 : index
    %c0_7 = arith.constant 0 : index
    %7 = vector.load %arg1[%c160, %c0_7] : memref<182x128xf32, #tpu.memory_space<vmem>>, vector<16x64xf32>
    %c176 = arith.constant 176 : index
    %c0_8 = arith.constant 0 : index
    %8 = vector.load %arg1[%c176, %c0_8] : memref<182x128xf32, #tpu.memory_space<vmem>>, vector<1x32xf32>
    %c177 = arith.constant 177 : index
    %c0_9 = arith.constant 0 : index
    %9 = vector.load %arg1[%c177, %c0_9] : memref<182x128xf32, #tpu.memory_space<vmem>>, vector<1x32xf32>
    %c178 = arith.constant 178 : index
    %c0_10 = arith.constant 0 : index
    %10 = vector.load %arg1[%c178, %c0_10] : memref<182x128xf32, #tpu.memory_space<vmem>>, vector<1x32xf32>
    %c179 = arith.constant 179 : index
    %c0_11 = arith.constant 0 : index
    %11 = vector.load %arg1[%c179, %c0_11] : memref<182x128xf32, #tpu.memory_space<vmem>>, vector<1x32xf32>
    %c180 = arith.constant 180 : index
    %c0_12 = arith.constant 0 : index
    %12 = vector.load %arg1[%c180, %c0_12] : memref<182x128xf32, #tpu.memory_space<vmem>>, vector<1x16xf32>
    %c181 = arith.constant 181 : index
    %c0_13 = arith.constant 0 : index
    %13 = vector.load %arg1[%c181, %c0_13] : memref<182x128xf32, #tpu.memory_space<vmem>>, vector<1x64xf32>
    %c0_14 = arith.constant 0 : index
    %c0_15 = arith.constant 0 : index
    %14 = vector.load %arg0[%c0_14, %c0_15] : memref<16x128xf32, #tpu.memory_space<vmem>>, vector<16x32xf32>
    %c0_16 = arith.constant 0 : index
    %c32 = arith.constant 32 : index
    %15 = vector.load %arg0[%c0_16, %c32] : memref<16x128xf32, #tpu.memory_space<vmem>>, vector<2x32xf32>
    %c0_17 = arith.constant 0 : index
    %c64_18 = arith.constant 64 : index
    %16 = vector.load %arg0[%c0_17, %c64_18] : memref<16x128xf32, #tpu.memory_space<vmem>>, vector<2x16xf32>
    %c0_19 = arith.constant 0 : index
    %c80_20 = arith.constant 80 : index
    %17 = vector.load %arg0[%c0_19, %c80_20] : memref<16x128xf32, #tpu.memory_space<vmem>>, vector<2x4xf32>
    %c0_21 = arith.constant 0 : index
    %c84 = arith.constant 84 : index
    %18 = vector.load %arg0[%c0_21, %c84] : memref<16x128xf32, #tpu.memory_space<vmem>>, vector<2x1xf32>
    %cst = arith.constant dense<0.000000e+00> : vector<2x32xf32>
    %19 = tpu.matmul %16, %0, %cst {dimension_numbers = #tpu.dot_dimension_numbers<[1], [0], [0], [1], [0, 0, 1, 1], [], []>} : vector<2x16xf32>, vector<16x32xf32>, vector<2x32xf32> -> vector<2x32xf32>
    %20 = vector.broadcast %8 : vector<1x32xf32> to vector<2x32xf32>
    %21 = arith.addf %19, %20 : vector<2x32xf32>
    %cst_22 = arith.constant 0.000000e+00 : f32
    %22 = vector.broadcast %cst_22 : f32 to vector<2x32xf32>
    %23 = arith.maximumf %21, %22 : vector<2x32xf32>
    %cst_23 = arith.constant dense<0.000000e+00> : vector<16x16xf32>
    %24 = tpu.matmul %14, %4, %cst_23 {dimension_numbers = #tpu.dot_dimension_numbers<[1], [0], [0], [1], [0, 0, 1, 1], [], []>} : vector<16x32xf32>, vector<32x16xf32>, vector<16x16xf32> -> vector<16x16xf32>
    %25 = vector.shape_cast %24 : vector<16x16xf32> to vector<2x8x16xf32>
    %26 = tpu.iota {dimensions = array<i32: 1>} : vector<8x8xi32>
    %27 = tpu.iota {dimensions = array<i32: 0>} : vector<8x8xi32>
    %28 = arith.cmpi sle, %26, %27 : vector<8x8xi32>
    %29 = arith.extui %28 : vector<8x8xi1> to vector<8x8xi32>
    %30 = arith.sitofp %29 : vector<8x8xi32> to vector<8x8xf32>
    %31 = tpu.iota {dimensions = array<i32: 1>} : vector<2x8xi32>
    %32 = tpu.iota {dimensions = array<i32: 1>} : vector<2x4xi32>
    %cst_24 = arith.constant 1.000000e+00 : f32
    %33 = vector.broadcast %cst_24 : f32 to vector<2x8xf32>
    %cst_25 = arith.constant 0.000000e+00 : f32
    %34 = vector.broadcast %cst_25 : f32 to vector<2x16xf32>
    %cst_26 = arith.constant 0.000000e+00 : f32
    %35 = vector.broadcast %cst_26 : f32 to vector<2x64xf32>
    %36 = vector.broadcast %13 : vector<1x64xf32> to vector<2x64xf32>
    %37 = arith.addf %35, %36 : vector<2x64xf32>
    %cst_27 = arith.constant dense<0.000000e+00> : vector<2x32xf32>
    %38 = tpu.matmul %15, %1, %cst_27 {dimension_numbers = #tpu.dot_dimension_numbers<[1], [0], [0], [1], [0, 0, 1, 1], [], []>} : vector<2x32xf32>, vector<32x32xf32>, vector<2x32xf32> -> vector<2x32xf32>
    %39 = arith.addf %23, %38 : vector<2x32xf32>
    %40 = vector.broadcast %9 : vector<1x32xf32> to vector<2x32xf32>
    %41 = arith.addf %39, %40 : vector<2x32xf32>
    %cst_28 = arith.constant 0.000000e+00 : f32
    %42 = vector.broadcast %cst_28 : f32 to vector<2x16xf32>
    %c0_i32 = arith.constant 0 : i32
    %43 = vector.broadcast %c0_i32 : i32 to vector<2x4xi32>
    %cst_29 = arith.constant dense<0.000000e+00> : vector<2x16xf32>
    %44 = tpu.matmul %41, %5, %cst_29 {dimension_numbers = #tpu.dot_dimension_numbers<[1], [0], [0], [1], [0, 0, 1, 1], [], []>} : vector<2x32xf32>, vector<32x16xf32>, vector<2x16xf32> -> vector<2x16xf32>
    %45 = vector.broadcast %12 : vector<1x16xf32> to vector<2x16xf32>
    %46 = arith.addf %44, %45 : vector<2x16xf32>
    %cst_30 = arith.constant 0.000000e+00 : f32
    %47 = vector.broadcast %cst_30 : f32 to vector<2x16xf32>
    %48 = arith.maximumf %46, %47 : vector<2x16xf32>
    %cst_31 = arith.constant dense<0.000000e+00> : vector<2x64xf32>
    %49 = tpu.matmul %48, %6, %cst_31 {dimension_numbers = #tpu.dot_dimension_numbers<[1], [0], [0], [1], [0, 0, 1, 1], [], []>} : vector<2x16xf32>, vector<16x64xf32>, vector<2x64xf32> -> vector<2x64xf32>
    %50 = arith.addf %49, %37 : vector<2x64xf32>
    %51 = vector.extract_strided_slice %50 {offsets = [0, 0], sizes = [2, 48], strides = [1, 1]} : vector<2x64xf32> to vector<2x48xf32>
    %52 = arith.negf %51 : vector<2x48xf32>
    %53 = math.exp %52 : vector<2x48xf32>
    %cst_32 = arith.constant 1.000000e+00 : f32
    %54 = vector.broadcast %cst_32 : f32 to vector<2x48xf32>
    %55 = arith.addf %54, %53 : vector<2x48xf32>
    %56 = arith.divf %54, %55 : vector<2x48xf32>
    %57 = vector.extract_strided_slice %50 {offsets = [0, 48], sizes = [2, 16], strides = [1, 1]} : vector<2x64xf32> to vector<2x16xf32>
    %58 = math.tanh %57 : vector<2x16xf32>
    %59 = vector.extract_strided_slice %56 {offsets = [0, 0], sizes = [2, 16], strides = [1, 1]} : vector<2x48xf32> to vector<2x16xf32>
    %60 = vector.extract_strided_slice %56 {offsets = [0, 16], sizes = [2, 16], strides = [1, 1]} : vector<2x48xf32> to vector<2x16xf32>
    %61 = vector.extract_strided_slice %56 {offsets = [0, 32], sizes = [2, 16], strides = [1, 1]} : vector<2x48xf32> to vector<2x16xf32>
    %62 = arith.mulf %60, %34 : vector<2x16xf32>
    %63 = arith.mulf %59, %58 : vector<2x16xf32>
    %64 = arith.addf %62, %63 : vector<2x16xf32>
    %65 = math.tanh %64 : vector<2x16xf32>
    %66 = arith.mulf %61, %65 : vector<2x16xf32>
    %cst_33 = arith.constant dense<0.000000e+00> : vector<2x64xf32>
    %67 = tpu.matmul %66, %7, %cst_33 {dimension_numbers = #tpu.dot_dimension_numbers<[1], [0], [0], [1], [0, 0, 1, 1], [], []>} : vector<2x16xf32>, vector<16x64xf32>, vector<2x64xf32> -> vector<2x64xf32>
    %68 = vector.broadcast %13 : vector<1x64xf32> to vector<2x64xf32>
    %69 = arith.addf %67, %68 : vector<2x64xf32>
    %70 = vector.shape_cast %66 : vector<2x16xf32> to vector<2x1x16xf32>
    %71 = vector.broadcast %70 : vector<2x1x16xf32> to vector<2x8x16xf32>
    %72 = arith.mulf %25, %71 : vector<2x8x16xf32>
    %cst_34 = arith.constant dense<0.000000e+00> : vector<2x8xf32>
    %73 = vector.multi_reduction <add>, %72, %cst_34 [2] : vector<2x8x16xf32> to vector<2x8xf32>
    %74 = arith.mulf %73, %33 : vector<2x8xf32>
    %cst_35 = arith.constant 1.000000e+00 : f32
    %75 = vector.broadcast %cst_35 : f32 to vector<2x8xf32>
    %76 = arith.mulf %74, %75 : vector<2x8xf32>
    %cst_36 = arith.constant dense<0xFF800000> : vector<2xf32>
    %77 = vector.multi_reduction <maximumf>, %76, %cst_36 [1] : vector<2x8xf32> to vector<2xf32>
    %78 = vector.shape_cast %77 : vector<2xf32> to vector<2x1xf32>
    %79 = vector.broadcast %78 : vector<2x1xf32> to vector<2x8xf32>
    %80 = arith.subf %76, %79 : vector<2x8xf32>
    %81 = math.exp %80 : vector<2x8xf32>
    %cst_37 = arith.constant dense<0.000000e+00> : vector<2xf32>
    %82 = vector.multi_reduction <add>, %81, %cst_37 [1] : vector<2x8xf32> to vector<2xf32>
    %83 = vector.shape_cast %82 : vector<2xf32> to vector<2x1xf32>
    %84 = vector.shape_cast %30 : vector<8x8xf32> to vector<1x8x8xf32>
    %85 = vector.shape_cast %81 : vector<2x8xf32> to vector<2x1x8xf32>
    %86 = vector.broadcast %84 : vector<1x8x8xf32> to vector<2x8x8xf32>
    %87 = vector.broadcast %85 : vector<2x1x8xf32> to vector<2x8x8xf32>
    %88 = arith.mulf %86, %87 : vector<2x8x8xf32>
    %cst_38 = arith.constant dense<0.000000e+00> : vector<2x8xf32>
    %89 = vector.multi_reduction <add>, %88, %cst_38 [2] : vector<2x8x8xf32> to vector<2x8xf32>
    %90 = vector.extract_strided_slice %17 {offsets = [0, 0], sizes = [2, 1], strides = [1, 1]} : vector<2x4xf32> to vector<2x1xf32>
    %91 = arith.mulf %90, %83 : vector<2x1xf32>
    %92 = vector.broadcast %91 : vector<2x1xf32> to vector<2x8xf32>
    %93 = arith.cmpf olt, %89, %92 : vector<2x8xf32>
    %94 = arith.extui %93 : vector<2x8xi1> to vector<2x8xi32>
    %cst_39 = arith.constant dense<0> : vector<2xi32>
    %95 = vector.multi_reduction <add>, %94, %cst_39 [1] : vector<2x8xi32> to vector<2xi32>
    %96 = vector.shape_cast %95 : vector<2xi32> to vector<2x1xi32>
    %c0_i32_40 = arith.constant 0 : i32
    %c7_i32 = arith.constant 7 : i32
    %97 = vector.broadcast %c0_i32_40 : i32 to vector<2x1xi32>
    %98 = arith.maxsi %97, %96 : vector<2x1xi32>
    %99 = vector.broadcast %c7_i32 : i32 to vector<2x1xi32>
    %100 = arith.minsi %99, %98 : vector<2x1xi32>
    %c0_i32_41 = arith.constant 0 : i32
    %101 = vector.broadcast %c0_i32_41 : i32 to vector<2x4xi32>
    %102 = arith.cmpi eq, %32, %101 : vector<2x4xi32>
    %103 = vector.shape_cast %100 : vector<2x1xi32> to vector<2x1xi32>
    %104 = vector.broadcast %103 : vector<2x1xi32> to vector<2x4xi32>
    %105 = arith.select %102, %104, %43 : vector<2x4xi1>, vector<2x4xi32>
    %106 = vector.broadcast %100 : vector<2x1xi32> to vector<2x8xi32>
    %107 = arith.cmpi eq, %31, %106 : vector<2x8xi32>
    %108 = arith.extui %107 : vector<2x8xi1> to vector<2x8xi32>
    %109 = arith.sitofp %108 : vector<2x8xi32> to vector<2x8xf32>
    %110 = vector.shape_cast %109 : vector<2x8xf32> to vector<2x8x1xf32>
    %111 = vector.broadcast %110 : vector<2x8x1xf32> to vector<2x8x16xf32>
    %112 = arith.mulf %25, %111 : vector<2x8x16xf32>
    %cst_42 = arith.constant dense<0.000000e+00> : vector<2x16xf32>
    %113 = vector.multi_reduction <add>, %112, %cst_42 [1] : vector<2x8x16xf32> to vector<2x16xf32>
    %cst_43 = arith.constant 1.250000e-01 : f32
    %114 = vector.broadcast %cst_43 : f32 to vector<2x16xf32>
    %115 = arith.subf %113, %114 : vector<2x16xf32>
    %116 = arith.addf %42, %115 : vector<2x16xf32>
    %cst_44 = arith.constant 1.000000e+00 : f32
    %117 = vector.broadcast %cst_44 : f32 to vector<2x8xf32>
    %118 = arith.subf %117, %109 : vector<2x8xf32>
    %119 = arith.mulf %33, %118 : vector<2x8xf32>
    %cst_45 = arith.constant dense<0.000000e+00> : vector<2x32xf32>
    %120 = tpu.matmul %115, %3, %cst_45 {dimension_numbers = #tpu.dot_dimension_numbers<[1], [0], [0], [1], [0, 0, 1, 1], [], []>} : vector<2x16xf32>, vector<16x32xf32>, vector<2x32xf32> -> vector<2x32xf32>
    %121 = arith.addf %41, %120 : vector<2x32xf32>
    %122 = vector.broadcast %11 : vector<1x32xf32> to vector<2x32xf32>
    %123 = arith.addf %121, %122 : vector<2x32xf32>
    %cst_46 = arith.constant dense<0.000000e+00> : vector<2x16xf32>
    %124 = tpu.matmul %123, %5, %cst_46 {dimension_numbers = #tpu.dot_dimension_numbers<[1], [0], [0], [1], [0, 0, 1, 1], [], []>} : vector<2x32xf32>, vector<32x16xf32>, vector<2x16xf32> -> vector<2x16xf32>
    %125 = vector.broadcast %12 : vector<1x16xf32> to vector<2x16xf32>
    %126 = arith.addf %124, %125 : vector<2x16xf32>
    %cst_47 = arith.constant 0.000000e+00 : f32
    %127 = vector.broadcast %cst_47 : f32 to vector<2x16xf32>
    %128 = arith.maximumf %126, %127 : vector<2x16xf32>
    %cst_48 = arith.constant dense<0.000000e+00> : vector<2x64xf32>
    %129 = tpu.matmul %128, %6, %cst_48 {dimension_numbers = #tpu.dot_dimension_numbers<[1], [0], [0], [1], [0, 0, 1, 1], [], []>} : vector<2x16xf32>, vector<16x64xf32>, vector<2x64xf32> -> vector<2x64xf32>
    %130 = arith.addf %129, %69 : vector<2x64xf32>
    %131 = vector.extract_strided_slice %130 {offsets = [0, 0], sizes = [2, 48], strides = [1, 1]} : vector<2x64xf32> to vector<2x48xf32>
    %132 = arith.negf %131 : vector<2x48xf32>
    %133 = math.exp %132 : vector<2x48xf32>
    %cst_49 = arith.constant 1.000000e+00 : f32
    %134 = vector.broadcast %cst_49 : f32 to vector<2x48xf32>
    %135 = arith.addf %134, %133 : vector<2x48xf32>
    %136 = arith.divf %134, %135 : vector<2x48xf32>
    %137 = vector.extract_strided_slice %130 {offsets = [0, 48], sizes = [2, 16], strides = [1, 1]} : vector<2x64xf32> to vector<2x16xf32>
    %138 = math.tanh %137 : vector<2x16xf32>
    %139 = vector.extract_strided_slice %136 {offsets = [0, 0], sizes = [2, 16], strides = [1, 1]} : vector<2x48xf32> to vector<2x16xf32>
    %140 = vector.extract_strided_slice %136 {offsets = [0, 16], sizes = [2, 16], strides = [1, 1]} : vector<2x48xf32> to vector<2x16xf32>
    %141 = vector.extract_strided_slice %136 {offsets = [0, 32], sizes = [2, 16], strides = [1, 1]} : vector<2x48xf32> to vector<2x16xf32>
    %142 = arith.mulf %140, %64 : vector<2x16xf32>
    %143 = arith.mulf %139, %138 : vector<2x16xf32>
    %144 = arith.addf %142, %143 : vector<2x16xf32>
    %145 = math.tanh %144 : vector<2x16xf32>
    %146 = arith.mulf %141, %145 : vector<2x16xf32>
    %cst_50 = arith.constant dense<0.000000e+00> : vector<2x64xf32>
    %147 = tpu.matmul %146, %7, %cst_50 {dimension_numbers = #tpu.dot_dimension_numbers<[1], [0], [0], [1], [0, 0, 1, 1], [], []>} : vector<2x16xf32>, vector<16x64xf32>, vector<2x64xf32> -> vector<2x64xf32>
    %148 = vector.broadcast %13 : vector<1x64xf32> to vector<2x64xf32>
    %149 = arith.addf %147, %148 : vector<2x64xf32>
    %150 = vector.shape_cast %146 : vector<2x16xf32> to vector<2x1x16xf32>
    %151 = vector.broadcast %150 : vector<2x1x16xf32> to vector<2x8x16xf32>
    %152 = arith.mulf %25, %151 : vector<2x8x16xf32>
    %cst_51 = arith.constant dense<0.000000e+00> : vector<2x8xf32>
    %153 = vector.multi_reduction <add>, %152, %cst_51 [2] : vector<2x8x16xf32> to vector<2x8xf32>
    %154 = arith.mulf %153, %119 : vector<2x8xf32>
    %cst_52 = arith.constant 1.000000e+00 : f32
    %155 = vector.broadcast %cst_52 : f32 to vector<2x8xf32>
    %156 = arith.mulf %154, %155 : vector<2x8xf32>
    %cst_53 = arith.constant dense<0xFF800000> : vector<2xf32>
    %157 = vector.multi_reduction <maximumf>, %156, %cst_53 [1] : vector<2x8xf32> to vector<2xf32>
    %158 = vector.shape_cast %157 : vector<2xf32> to vector<2x1xf32>
    %159 = vector.broadcast %158 : vector<2x1xf32> to vector<2x8xf32>
    %160 = arith.subf %156, %159 : vector<2x8xf32>
    %161 = math.exp %160 : vector<2x8xf32>
    %cst_54 = arith.constant dense<0.000000e+00> : vector<2xf32>
    %162 = vector.multi_reduction <add>, %161, %cst_54 [1] : vector<2x8xf32> to vector<2xf32>
    %163 = vector.shape_cast %162 : vector<2xf32> to vector<2x1xf32>
    %164 = vector.shape_cast %30 : vector<8x8xf32> to vector<1x8x8xf32>
    %165 = vector.shape_cast %161 : vector<2x8xf32> to vector<2x1x8xf32>
    %166 = vector.broadcast %164 : vector<1x8x8xf32> to vector<2x8x8xf32>
    %167 = vector.broadcast %165 : vector<2x1x8xf32> to vector<2x8x8xf32>
    %168 = arith.mulf %166, %167 : vector<2x8x8xf32>
    %cst_55 = arith.constant dense<0.000000e+00> : vector<2x8xf32>
    %169 = vector.multi_reduction <add>, %168, %cst_55 [2] : vector<2x8x8xf32> to vector<2x8xf32>
    %170 = vector.extract_strided_slice %17 {offsets = [0, 1], sizes = [2, 1], strides = [1, 1]} : vector<2x4xf32> to vector<2x1xf32>
    %171 = arith.mulf %170, %163 : vector<2x1xf32>
    %172 = vector.broadcast %171 : vector<2x1xf32> to vector<2x8xf32>
    %173 = arith.cmpf olt, %169, %172 : vector<2x8xf32>
    %174 = arith.extui %173 : vector<2x8xi1> to vector<2x8xi32>
    %cst_56 = arith.constant dense<0> : vector<2xi32>
    %175 = vector.multi_reduction <add>, %174, %cst_56 [1] : vector<2x8xi32> to vector<2xi32>
    %176 = vector.shape_cast %175 : vector<2xi32> to vector<2x1xi32>
    %c0_i32_57 = arith.constant 0 : i32
    %c7_i32_58 = arith.constant 7 : i32
    %177 = vector.broadcast %c0_i32_57 : i32 to vector<2x1xi32>
    %178 = arith.maxsi %177, %176 : vector<2x1xi32>
    %179 = vector.broadcast %c7_i32_58 : i32 to vector<2x1xi32>
    %180 = arith.minsi %179, %178 : vector<2x1xi32>
    %c1_i32 = arith.constant 1 : i32
    %181 = vector.broadcast %c1_i32 : i32 to vector<2x4xi32>
    %182 = arith.cmpi eq, %32, %181 : vector<2x4xi32>
    %183 = vector.shape_cast %180 : vector<2x1xi32> to vector<2x1xi32>
    %184 = vector.broadcast %183 : vector<2x1xi32> to vector<2x4xi32>
    %185 = arith.select %182, %184, %105 : vector<2x4xi1>, vector<2x4xi32>
    %186 = vector.broadcast %180 : vector<2x1xi32> to vector<2x8xi32>
    %187 = arith.cmpi eq, %31, %186 : vector<2x8xi32>
    %188 = arith.extui %187 : vector<2x8xi1> to vector<2x8xi32>
    %189 = arith.sitofp %188 : vector<2x8xi32> to vector<2x8xf32>
    %190 = vector.shape_cast %189 : vector<2x8xf32> to vector<2x8x1xf32>
    %191 = vector.broadcast %190 : vector<2x8x1xf32> to vector<2x8x16xf32>
    %192 = arith.mulf %25, %191 : vector<2x8x16xf32>
    %cst_59 = arith.constant dense<0.000000e+00> : vector<2x16xf32>
    %193 = vector.multi_reduction <add>, %192, %cst_59 [1] : vector<2x8x16xf32> to vector<2x16xf32>
    %cst_60 = arith.constant 1.250000e-01 : f32
    %194 = vector.broadcast %cst_60 : f32 to vector<2x16xf32>
    %195 = arith.subf %193, %194 : vector<2x16xf32>
    %196 = arith.addf %116, %195 : vector<2x16xf32>
    %cst_61 = arith.constant 1.000000e+00 : f32
    %197 = vector.broadcast %cst_61 : f32 to vector<2x8xf32>
    %198 = arith.subf %197, %189 : vector<2x8xf32>
    %199 = arith.mulf %119, %198 : vector<2x8xf32>
    %cst_62 = arith.constant dense<0.000000e+00> : vector<2x32xf32>
    %200 = tpu.matmul %195, %3, %cst_62 {dimension_numbers = #tpu.dot_dimension_numbers<[1], [0], [0], [1], [0, 0, 1, 1], [], []>} : vector<2x16xf32>, vector<16x32xf32>, vector<2x32xf32> -> vector<2x32xf32>
    %201 = arith.addf %123, %200 : vector<2x32xf32>
    %202 = vector.broadcast %11 : vector<1x32xf32> to vector<2x32xf32>
    %203 = arith.addf %201, %202 : vector<2x32xf32>
    %cst_63 = arith.constant dense<0.000000e+00> : vector<2x16xf32>
    %204 = tpu.matmul %203, %5, %cst_63 {dimension_numbers = #tpu.dot_dimension_numbers<[1], [0], [0], [1], [0, 0, 1, 1], [], []>} : vector<2x32xf32>, vector<32x16xf32>, vector<2x16xf32> -> vector<2x16xf32>
    %205 = vector.broadcast %12 : vector<1x16xf32> to vector<2x16xf32>
    %206 = arith.addf %204, %205 : vector<2x16xf32>
    %cst_64 = arith.constant 0.000000e+00 : f32
    %207 = vector.broadcast %cst_64 : f32 to vector<2x16xf32>
    %208 = arith.maximumf %206, %207 : vector<2x16xf32>
    %cst_65 = arith.constant dense<0.000000e+00> : vector<2x64xf32>
    %209 = tpu.matmul %208, %6, %cst_65 {dimension_numbers = #tpu.dot_dimension_numbers<[1], [0], [0], [1], [0, 0, 1, 1], [], []>} : vector<2x16xf32>, vector<16x64xf32>, vector<2x64xf32> -> vector<2x64xf32>
    %210 = arith.addf %209, %149 : vector<2x64xf32>
    %211 = vector.extract_strided_slice %210 {offsets = [0, 0], sizes = [2, 48], strides = [1, 1]} : vector<2x64xf32> to vector<2x48xf32>
    %212 = arith.negf %211 : vector<2x48xf32>
    %213 = math.exp %212 : vector<2x48xf32>
    %cst_66 = arith.constant 1.000000e+00 : f32
    %214 = vector.broadcast %cst_66 : f32 to vector<2x48xf32>
    %215 = arith.addf %214, %213 : vector<2x48xf32>
    %216 = arith.divf %214, %215 : vector<2x48xf32>
    %217 = vector.extract_strided_slice %210 {offsets = [0, 48], sizes = [2, 16], strides = [1, 1]} : vector<2x64xf32> to vector<2x16xf32>
    %218 = math.tanh %217 : vector<2x16xf32>
    %219 = vector.extract_strided_slice %216 {offsets = [0, 0], sizes = [2, 16], strides = [1, 1]} : vector<2x48xf32> to vector<2x16xf32>
    %220 = vector.extract_strided_slice %216 {offsets = [0, 16], sizes = [2, 16], strides = [1, 1]} : vector<2x48xf32> to vector<2x16xf32>
    %221 = vector.extract_strided_slice %216 {offsets = [0, 32], sizes = [2, 16], strides = [1, 1]} : vector<2x48xf32> to vector<2x16xf32>
    %222 = arith.mulf %220, %144 : vector<2x16xf32>
    %223 = arith.mulf %219, %218 : vector<2x16xf32>
    %224 = arith.addf %222, %223 : vector<2x16xf32>
    %225 = math.tanh %224 : vector<2x16xf32>
    %226 = arith.mulf %221, %225 : vector<2x16xf32>
    %cst_67 = arith.constant dense<0.000000e+00> : vector<2x64xf32>
    %227 = tpu.matmul %226, %7, %cst_67 {dimension_numbers = #tpu.dot_dimension_numbers<[1], [0], [0], [1], [0, 0, 1, 1], [], []>} : vector<2x16xf32>, vector<16x64xf32>, vector<2x64xf32> -> vector<2x64xf32>
    %228 = vector.broadcast %13 : vector<1x64xf32> to vector<2x64xf32>
    %229 = arith.addf %227, %228 : vector<2x64xf32>
    %230 = vector.shape_cast %226 : vector<2x16xf32> to vector<2x1x16xf32>
    %231 = vector.broadcast %230 : vector<2x1x16xf32> to vector<2x8x16xf32>
    %232 = arith.mulf %25, %231 : vector<2x8x16xf32>
    %cst_68 = arith.constant dense<0.000000e+00> : vector<2x8xf32>
    %233 = vector.multi_reduction <add>, %232, %cst_68 [2] : vector<2x8x16xf32> to vector<2x8xf32>
    %234 = arith.mulf %233, %199 : vector<2x8xf32>
    %cst_69 = arith.constant 1.000000e+00 : f32
    %235 = vector.broadcast %cst_69 : f32 to vector<2x8xf32>
    %236 = arith.mulf %234, %235 : vector<2x8xf32>
    %cst_70 = arith.constant dense<0xFF800000> : vector<2xf32>
    %237 = vector.multi_reduction <maximumf>, %236, %cst_70 [1] : vector<2x8xf32> to vector<2xf32>
    %238 = vector.shape_cast %237 : vector<2xf32> to vector<2x1xf32>
    %239 = vector.broadcast %238 : vector<2x1xf32> to vector<2x8xf32>
    %240 = arith.subf %236, %239 : vector<2x8xf32>
    %241 = math.exp %240 : vector<2x8xf32>
    %cst_71 = arith.constant dense<0.000000e+00> : vector<2xf32>
    %242 = vector.multi_reduction <add>, %241, %cst_71 [1] : vector<2x8xf32> to vector<2xf32>
    %243 = vector.shape_cast %242 : vector<2xf32> to vector<2x1xf32>
    %244 = vector.shape_cast %30 : vector<8x8xf32> to vector<1x8x8xf32>
    %245 = vector.shape_cast %241 : vector<2x8xf32> to vector<2x1x8xf32>
    %246 = vector.broadcast %244 : vector<1x8x8xf32> to vector<2x8x8xf32>
    %247 = vector.broadcast %245 : vector<2x1x8xf32> to vector<2x8x8xf32>
    %248 = arith.mulf %246, %247 : vector<2x8x8xf32>
    %cst_72 = arith.constant dense<0.000000e+00> : vector<2x8xf32>
    %249 = vector.multi_reduction <add>, %248, %cst_72 [2] : vector<2x8x8xf32> to vector<2x8xf32>
    %250 = vector.extract_strided_slice %17 {offsets = [0, 2], sizes = [2, 1], strides = [1, 1]} : vector<2x4xf32> to vector<2x1xf32>
    %251 = arith.mulf %250, %243 : vector<2x1xf32>
    %252 = vector.broadcast %251 : vector<2x1xf32> to vector<2x8xf32>
    %253 = arith.cmpf olt, %249, %252 : vector<2x8xf32>
    %254 = arith.extui %253 : vector<2x8xi1> to vector<2x8xi32>
    %cst_73 = arith.constant dense<0> : vector<2xi32>
    %255 = vector.multi_reduction <add>, %254, %cst_73 [1] : vector<2x8xi32> to vector<2xi32>
    %256 = vector.shape_cast %255 : vector<2xi32> to vector<2x1xi32>
    %c0_i32_74 = arith.constant 0 : i32
    %c7_i32_75 = arith.constant 7 : i32
    %257 = vector.broadcast %c0_i32_74 : i32 to vector<2x1xi32>
    %258 = arith.maxsi %257, %256 : vector<2x1xi32>
    %259 = vector.broadcast %c7_i32_75 : i32 to vector<2x1xi32>
    %260 = arith.minsi %259, %258 : vector<2x1xi32>
    %c2_i32 = arith.constant 2 : i32
    %261 = vector.broadcast %c2_i32 : i32 to vector<2x4xi32>
    %262 = arith.cmpi eq, %32, %261 : vector<2x4xi32>
    %263 = vector.shape_cast %260 : vector<2x1xi32> to vector<2x1xi32>
    %264 = vector.broadcast %263 : vector<2x1xi32> to vector<2x4xi32>
    %265 = arith.select %262, %264, %185 : vector<2x4xi1>, vector<2x4xi32>
    %266 = vector.broadcast %260 : vector<2x1xi32> to vector<2x8xi32>
    %267 = arith.cmpi eq, %31, %266 : vector<2x8xi32>
    %268 = arith.extui %267 : vector<2x8xi1> to vector<2x8xi32>
    %269 = arith.sitofp %268 : vector<2x8xi32> to vector<2x8xf32>
    %270 = vector.shape_cast %269 : vector<2x8xf32> to vector<2x8x1xf32>
    %271 = vector.broadcast %270 : vector<2x8x1xf32> to vector<2x8x16xf32>
    %272 = arith.mulf %25, %271 : vector<2x8x16xf32>
    %cst_76 = arith.constant dense<0.000000e+00> : vector<2x16xf32>
    %273 = vector.multi_reduction <add>, %272, %cst_76 [1] : vector<2x8x16xf32> to vector<2x16xf32>
    %cst_77 = arith.constant 1.250000e-01 : f32
    %274 = vector.broadcast %cst_77 : f32 to vector<2x16xf32>
    %275 = arith.subf %273, %274 : vector<2x16xf32>
    %276 = arith.addf %196, %275 : vector<2x16xf32>
    %cst_78 = arith.constant 1.000000e+00 : f32
    %277 = vector.broadcast %cst_78 : f32 to vector<2x8xf32>
    %278 = arith.subf %277, %269 : vector<2x8xf32>
    %279 = arith.mulf %199, %278 : vector<2x8xf32>
    %cst_79 = arith.constant dense<0.000000e+00> : vector<2x32xf32>
    %280 = tpu.matmul %275, %3, %cst_79 {dimension_numbers = #tpu.dot_dimension_numbers<[1], [0], [0], [1], [0, 0, 1, 1], [], []>} : vector<2x16xf32>, vector<16x32xf32>, vector<2x32xf32> -> vector<2x32xf32>
    %281 = arith.addf %203, %280 : vector<2x32xf32>
    %282 = vector.broadcast %11 : vector<1x32xf32> to vector<2x32xf32>
    %283 = arith.addf %281, %282 : vector<2x32xf32>
    %cst_80 = arith.constant dense<0.000000e+00> : vector<2x16xf32>
    %284 = tpu.matmul %283, %5, %cst_80 {dimension_numbers = #tpu.dot_dimension_numbers<[1], [0], [0], [1], [0, 0, 1, 1], [], []>} : vector<2x32xf32>, vector<32x16xf32>, vector<2x16xf32> -> vector<2x16xf32>
    %285 = vector.broadcast %12 : vector<1x16xf32> to vector<2x16xf32>
    %286 = arith.addf %284, %285 : vector<2x16xf32>
    %cst_81 = arith.constant 0.000000e+00 : f32
    %287 = vector.broadcast %cst_81 : f32 to vector<2x16xf32>
    %288 = arith.maximumf %286, %287 : vector<2x16xf32>
    %cst_82 = arith.constant dense<0.000000e+00> : vector<2x64xf32>
    %289 = tpu.matmul %288, %6, %cst_82 {dimension_numbers = #tpu.dot_dimension_numbers<[1], [0], [0], [1], [0, 0, 1, 1], [], []>} : vector<2x16xf32>, vector<16x64xf32>, vector<2x64xf32> -> vector<2x64xf32>
    %290 = arith.addf %289, %229 : vector<2x64xf32>
    %291 = vector.extract_strided_slice %290 {offsets = [0, 0], sizes = [2, 48], strides = [1, 1]} : vector<2x64xf32> to vector<2x48xf32>
    %292 = arith.negf %291 : vector<2x48xf32>
    %293 = math.exp %292 : vector<2x48xf32>
    %cst_83 = arith.constant 1.000000e+00 : f32
    %294 = vector.broadcast %cst_83 : f32 to vector<2x48xf32>
    %295 = arith.addf %294, %293 : vector<2x48xf32>
    %296 = arith.divf %294, %295 : vector<2x48xf32>
    %297 = vector.extract_strided_slice %290 {offsets = [0, 48], sizes = [2, 16], strides = [1, 1]} : vector<2x64xf32> to vector<2x16xf32>
    %298 = math.tanh %297 : vector<2x16xf32>
    %299 = vector.extract_strided_slice %296 {offsets = [0, 0], sizes = [2, 16], strides = [1, 1]} : vector<2x48xf32> to vector<2x16xf32>
    %300 = vector.extract_strided_slice %296 {offsets = [0, 16], sizes = [2, 16], strides = [1, 1]} : vector<2x48xf32> to vector<2x16xf32>
    %301 = vector.extract_strided_slice %296 {offsets = [0, 32], sizes = [2, 16], strides = [1, 1]} : vector<2x48xf32> to vector<2x16xf32>
    %302 = arith.mulf %300, %224 : vector<2x16xf32>
    %303 = arith.mulf %299, %298 : vector<2x16xf32>
    %304 = arith.addf %302, %303 : vector<2x16xf32>
    %305 = math.tanh %304 : vector<2x16xf32>
    %306 = arith.mulf %301, %305 : vector<2x16xf32>
    %307 = vector.shape_cast %306 : vector<2x16xf32> to vector<2x1x16xf32>
    %308 = vector.broadcast %307 : vector<2x1x16xf32> to vector<2x8x16xf32>
    %309 = arith.mulf %25, %308 : vector<2x8x16xf32>
    %cst_84 = arith.constant dense<0.000000e+00> : vector<2x8xf32>
    %310 = vector.multi_reduction <add>, %309, %cst_84 [2] : vector<2x8x16xf32> to vector<2x8xf32>
    %311 = arith.mulf %310, %279 : vector<2x8xf32>
    %cst_85 = arith.constant 1.000000e+00 : f32
    %312 = vector.broadcast %cst_85 : f32 to vector<2x8xf32>
    %313 = arith.mulf %311, %312 : vector<2x8xf32>
    %cst_86 = arith.constant dense<0xFF800000> : vector<2xf32>
    %314 = vector.multi_reduction <maximumf>, %313, %cst_86 [1] : vector<2x8xf32> to vector<2xf32>
    %315 = vector.shape_cast %314 : vector<2xf32> to vector<2x1xf32>
    %316 = vector.broadcast %315 : vector<2x1xf32> to vector<2x8xf32>
    %317 = arith.subf %313, %316 : vector<2x8xf32>
    %318 = math.exp %317 : vector<2x8xf32>
    %cst_87 = arith.constant dense<0.000000e+00> : vector<2xf32>
    %319 = vector.multi_reduction <add>, %318, %cst_87 [1] : vector<2x8xf32> to vector<2xf32>
    %320 = vector.shape_cast %319 : vector<2xf32> to vector<2x1xf32>
    %321 = vector.shape_cast %30 : vector<8x8xf32> to vector<1x8x8xf32>
    %322 = vector.shape_cast %318 : vector<2x8xf32> to vector<2x1x8xf32>
    %323 = vector.broadcast %321 : vector<1x8x8xf32> to vector<2x8x8xf32>
    %324 = vector.broadcast %322 : vector<2x1x8xf32> to vector<2x8x8xf32>
    %325 = arith.mulf %323, %324 : vector<2x8x8xf32>
    %cst_88 = arith.constant dense<0.000000e+00> : vector<2x8xf32>
    %326 = vector.multi_reduction <add>, %325, %cst_88 [2] : vector<2x8x8xf32> to vector<2x8xf32>
    %327 = vector.extract_strided_slice %17 {offsets = [0, 3], sizes = [2, 1], strides = [1, 1]} : vector<2x4xf32> to vector<2x1xf32>
    %328 = arith.mulf %327, %320 : vector<2x1xf32>
    %329 = vector.broadcast %328 : vector<2x1xf32> to vector<2x8xf32>
    %330 = arith.cmpf olt, %326, %329 : vector<2x8xf32>
    %331 = arith.extui %330 : vector<2x8xi1> to vector<2x8xi32>
    %cst_89 = arith.constant dense<0> : vector<2xi32>
    %332 = vector.multi_reduction <add>, %331, %cst_89 [1] : vector<2x8xi32> to vector<2xi32>
    %333 = vector.shape_cast %332 : vector<2xi32> to vector<2x1xi32>
    %c0_i32_90 = arith.constant 0 : i32
    %c7_i32_91 = arith.constant 7 : i32
    %334 = vector.broadcast %c0_i32_90 : i32 to vector<2x1xi32>
    %335 = arith.maxsi %334, %333 : vector<2x1xi32>
    %336 = vector.broadcast %c7_i32_91 : i32 to vector<2x1xi32>
    %337 = arith.minsi %336, %335 : vector<2x1xi32>
    %c3_i32 = arith.constant 3 : i32
    %338 = vector.broadcast %c3_i32 : i32 to vector<2x4xi32>
    %339 = arith.cmpi eq, %32, %338 : vector<2x4xi32>
    %340 = vector.shape_cast %337 : vector<2x1xi32> to vector<2x1xi32>
    %341 = vector.broadcast %340 : vector<2x1xi32> to vector<2x4xi32>
    %342 = arith.select %339, %341, %265 : vector<2x4xi1>, vector<2x4xi32>
    %343 = vector.broadcast %337 : vector<2x1xi32> to vector<2x8xi32>
    %344 = arith.cmpi eq, %31, %343 : vector<2x8xi32>
    %345 = arith.extui %344 : vector<2x8xi1> to vector<2x8xi32>
    %346 = arith.sitofp %345 : vector<2x8xi32> to vector<2x8xf32>
    %347 = vector.shape_cast %346 : vector<2x8xf32> to vector<2x8x1xf32>
    %348 = vector.broadcast %347 : vector<2x8x1xf32> to vector<2x8x16xf32>
    %349 = arith.mulf %25, %348 : vector<2x8x16xf32>
    %cst_92 = arith.constant dense<0.000000e+00> : vector<2x16xf32>
    %350 = vector.multi_reduction <add>, %349, %cst_92 [1] : vector<2x8x16xf32> to vector<2x16xf32>
    %cst_93 = arith.constant 1.250000e-01 : f32
    %351 = vector.broadcast %cst_93 : f32 to vector<2x16xf32>
    %352 = arith.subf %350, %351 : vector<2x16xf32>
    %353 = arith.addf %276, %352 : vector<2x16xf32>
    %cst_94 = arith.constant dense<0.000000e+00> : vector<2x32xf32>
    %354 = tpu.matmul %353, %2, %cst_94 {dimension_numbers = #tpu.dot_dimension_numbers<[1], [0], [0], [1], [0, 0, 1, 1], [], []>} : vector<2x16xf32>, vector<16x32xf32>, vector<2x32xf32> -> vector<2x32xf32>
    %355 = arith.addf %15, %354 : vector<2x32xf32>
    %cst_95 = arith.constant 4.000000e+00 : f32
    %356 = vector.broadcast %cst_95 : f32 to vector<1x32xf32>
    %357 = arith.mulf %356, %10 : vector<1x32xf32>
    %358 = vector.broadcast %357 : vector<1x32xf32> to vector<2x32xf32>
    %359 = arith.addf %355, %358 : vector<2x32xf32>
    %cst_96 = arith.constant 0.000000e+00 : f32
    %360 = vector.broadcast %cst_96 : f32 to vector<2x60xf32>
    %361 = vector.broadcast %18 : vector<2x1xf32> to vector<2x8xf32>
    %362 = arith.mulf %76, %361 : vector<2x8xf32>
    %363 = vector.broadcast %18 : vector<2x1xf32> to vector<2x8xf32>
    %364 = arith.mulf %156, %363 : vector<2x8xf32>
    %365 = vector.broadcast %18 : vector<2x1xf32> to vector<2x8xf32>
    %366 = arith.mulf %236, %365 : vector<2x8xf32>
    %367 = vector.broadcast %18 : vector<2x1xf32> to vector<2x8xf32>
    %368 = arith.mulf %313, %367 : vector<2x8xf32>
    %369 = vector.broadcast %18 : vector<2x1xf32> to vector<2x32xf32>
    %370 = arith.mulf %359, %369 : vector<2x32xf32>
    %371 = arith.sitofp %342 : vector<2x4xi32> to vector<2x4xf32>
    %372 = vector.broadcast %18 : vector<2x1xf32> to vector<2x4xf32>
    %373 = arith.mulf %371, %372 : vector<2x4xf32>
    %374 = tpu.concatenate %362, %364, %366, %368, %370, %373, %360 in 1 : vector<2x8xf32>, vector<2x8xf32>, vector<2x8xf32>, vector<2x8xf32>, vector<2x32xf32>, vector<2x4xf32>, vector<2x60xf32> -> vector<2x128xf32>
    %c0_97 = arith.constant 0 : index
    %c0_98 = arith.constant 0 : index
    %375 = vector.load %arg2[%c0_97, %c0_98] : memref<2x128xf32, #tpu.memory_space<vmem>>, vector<2x128xf32>
    tpu.vector_store %arg2[%c0_97, %c0_98], %374 {strides = array<i32>} : memref<2x128xf32, #tpu.memory_space<vmem>>, vector<2x128xf32>,
    return
  }
}

</mosaic_0001>

<bundles_post_ra>
// kernel: tpu_custom_call.1
= control target key start
LH: loop header
LB: loop body
LE: loop exit
PB: predicated region body
PF: predicated region fallthrough
CT: control target
= control target key end

     0   :  { %7 = vsyncpa [#allocation3], 0  ;;  %s2194_s0 = inlined_call_operand.hbm [shape: f32[16,128], index: 0, kind: input, shape index: {}]   ;;  %s2195_s1 = inlined_call_operand.hbm [shape: f32[182,128], index: 1, kind: input, shape index: {}]   ;;  %s2196_s2 = inlined_call_operand.hbm [shape: f32[2,128], index: 2, kind: output, shape index: {}]  }
   0x1   :  { %8 = vsyncpa [#allocation6], 0 }
   0x2   :  { %9 = vsyncpa [#allocation4], 0  ;;  %s14_s11 = sshll.u32 %s2194_s0, 4  ;;  %s1734_s12 = smov [#allocation2]   ;;  %s15_s11 = int_to_ptr.hbm [resolvable:$true] %s14_s11 }
   0x3   :  { %s16_s13 = sshll.u32 %s1734_s12, 4  ;;  %s27_s16 = sshll.u32 %s2195_s1, 4  ;;  %s17_s13 = int_to_ptr.vmem [resolvable:$true] %s16_s13  ;;  %s28_s16 = int_to_ptr.hbm [resolvable:$true] %s27_s16 }
   0x4   :  { %s1735_s17 = smov 128   ;;  %s1736_s18 = smov 8  }
   0x5   :  { %22 = dma.hbm_to_vmem [thread:$0]  %s15_s11, 256, %s17_s13, [#allocation3], %s1735_s17, %s1735_s17, %s1736_s18  }
   0x6   :  { %s1737_s19 = smov [#allocation5]  }
   0x7   :  { %s29_s20 = sshll.u32 %s1737_s19, 4  ;;  %s30_s20 = int_to_ptr.vmem [resolvable:$true] %s29_s20 }
   0x8   :  { %35 = dma.hbm_to_vmem [thread:$0]  %s28_s16, 2944, %s30_s20, [#allocation6], %s1735_s17, %s1735_s17, %s1736_s18  }
   0x9   :  { %1728 = dma.done.wait [#allocation3], 256  }
   0xa   :  { %1729 = vsyncadd [#allocation3], 4294967040 }
   0xb   :  { %1730 = dma.done.wait [#allocation6], 2944  }
   0xc   :  { %1731 = vsyncadd [#allocation6], 4294964352  ;;  %v1772_v0 = vld [vmem:[#allocation2] sm:$0x3]  ;;  %v49_v1 = vld [vmem:[#allocation5 + $0x28] sm:$0xff]  ;;  %s1738_s0 = smov 96  }
   0xd   :  { %v48_v2 = vld [vmem:[#allocation5 + $0x20] sm:$0xff]  ;;  %142 = vrot.lane.b32.xlu0 %v1772_v0, %s1738_s0  ;;  %158 = vmatpush.msra.mxu2 %v49_v1  ;;  %v47_v3 = vld [vmem:[#allocation5 + $0x18] sm:$0xff]  ;;  %s1739_s1 = smov 64   ;;  %v46_v4 = vld [vmem:[#allocation5 + $0x10] sm:$0xff]  ;;  %vm103_vm0 = vcmask 261120   ;;  %vm79_vm1 = vcmask 130048  }
   0xe   :  { %v45_v5 = vld [vmem:[#allocation5 + $0x8] sm:$0xff]  ;;  %v44_v6 = vld [vmem:[#allocation5] sm:$0xff]  ;;  %v1786_v11 = vld [vmem:[#allocation5 + $0x78] sm:$0xff]  ;;  %s1740_s21 = smov 80   ;;  %s1741_s22 = smov 16   ;;  %vm300_vm6 = vcmask 1041409  }
   0xf   :  { %159 = vmatpush.msra.mxu2 %v48_v2  ;;  %96 = vmatpush.msra.mxu0 %v45_v5  ;;  %v1780_v9 = vld [vmem:[#allocation5 + $0x88] sm:$0xff]  ;;  %v1783_v10 = vld [vmem:[#allocation5 + $0x80] sm:$0xff]  ;;  %v1788_v12 = vld [vmem:[#allocation5 + $0x70] sm:$0xff]  ;;  %vm303_vm7 = vcmask 58368   ;;  %vm355_vm9 = vcmask 64512   ;;  %s1749_s23 = smov 32  }
  0x10   :  { %185 = vmatpush.msra.mxu3 %v1780_v9  ;;  %v1792_v13 = vld [vmem:[#allocation5 + $0x98] sm:$0xff]  ;;  %v1600_v14 = vld [vmem:[#allocation5 + $0xb0] ss:$0 sm:$0xff]  ;;  %v1601_v18 = vld [vmem:[#allocation5 + $0xb1] ss:$0 sm:$0xff]  ;;  %s1750_s24 = smov [#allocation7]  }
  0x11   :  { %160 = vmatpush.msra.mxu2 %v47_v3  ;;  %97 = vmatpush.msra.mxu0 %v44_v6  ;;  %v1799_v22 = vld [vmem:[#allocation5 + $0x90] sm:$0xff]  ;;  %v57_v46 = vld [vmem:[#allocation5 + $0x68] sm:$0xff]  ;;  %v56_v47 = vld [vmem:[#allocation5 + $0x60] sm:$0xff]  ;;  %v133_v6 = vlaneseq  ;;  %s1487_s25 = sshll.u32 %s1750_s24, 4  ;;  %s1489_s28 = sshll.u32 %s2196_s2, 4  ;;  %s1488_s25 = int_to_ptr.vmem [resolvable:$true] %s1487_s25  ;;  %s1490_s28 = int_to_ptr.hbm [resolvable:$true] %s1489_s28 }
  0x12   :  { %186 = vmatpush.msra.mxu3 %v1783_v10  ;;  %v1806_v23 = vld [vmem:[#allocation5 + $0xb4] ss:$0 sm:$0xff]  ;;  %v1814_v27 = vld [vmem:[#allocation5 + $0xb5] ss:$0 sm:$0xff]  ;;  %122 = vmatpush.msra.mxu1 %v57_v46  ;;  %v55_v48 = vld [vmem:[#allocation5 + $0x58] sm:$0xff]  ;;  %v1744_v46 = vmov 80  }
  0x13   :  { %161 = vmatpush.msra.mxu2 %v46_v4  ;;  %211 = vmatpush.msrb.mxu0 %v1792_v13  ;;  %v54_v49 = vld [vmem:[#allocation5 + $0x50] sm:$0xff]  ;;  %v73_v51 = vld [vmem:[#allocation2 + $0x8] sm:$0xff] }
  0x14   :  { %187 = vmatpush.msra.mxu3 %v1786_v11  ;;  %123 = vmatpush.msra.mxu1 %v56_v47  ;;  %v72_v50 = vld [vmem:[#allocation2] sm:$0xff] }
  0x15   :  { %77 = vrot.lane.b32.xlu0 %v1772_v0, %s1739_s1  ;;  %212 = vmatpush.msrb.mxu0 %v1799_v22 }
  0x16   :  { %188 = vmatpush.msra.mxu3 %v1788_v12  ;;  %124 = vmatpush.msra.mxu1 %v55_v48 }
  0x17   :  { %1555 = vset.pattern.permute.xlu0 %v1744_v46 }
  0x18   :  { %125 = vmatpush.msra.mxu1 %v54_v49 }
  0x19   :  { %1501 = vmatmul.msk.f32.vlgmr.msra.gmra.mxu1 %vm103_vm0, %v72_v50 }
  0x1a   :  { %510 = vmatpush.msrb.mxu1 %v1792_v13 }
  0x1c   :  { %511 = vmatpush.msrb.mxu1 %v1799_v22 }
  0x1e   :  { %825 = vmatpush.msra.mxu1 %v1792_v13 }
  0x20   :  { %826 = vmatpush.msra.mxu1 %v1799_v22 }
  0x21   :  { %1502 = vmatmul.msk.f32.gmra.mxu1 %vm103_vm0, %v73_v51 }
  0x7f   :  { %v143_v7 = vpop.permute.xlu0 %142 }
  0x80   :  { %1504 = vmatmul.msk.f32.vlgmr.msra.gmra.mxu2 %vm103_vm0, %v143_v7  ;;  %v1843_v7 = vand.u32 127, %v133_v6 }
  0x87   :  { %v78_v8 = vpop.permute.xlu0 %77 }
  0x88   :  { %1500 = vmatmul.msk.f32.vlgmr.msra.gmra.mxu0 %vm79_vm1, %v78_v8 }
  0x89   :  { %484 = vmatpush.msra.mxu0 %v1780_v9 }
  0x8b   :  { %485 = vmatpush.msra.mxu0 %v1783_v10 }
  0x8d   :  { %486 = vmatpush.msra.mxu0 %v1786_v11 }
  0x8f   :  { %487 = vmatpush.msra.mxu0 %v1788_v12 }
  0x96   :  { %v1835_v61 = vpop.f32.mrf.mxu1 }
  0x9e   :  { %v1839_v2 = vpop.f32.mrf.mxu1 }
 0x103   :  { %v163_v19 = vpop.f32.mrf.mxu2 }
 0x105   :  { %v99_v15 = vpop.f32.mrf.mxu0 }
 0x106   :  { %v100_v16 = vadd.f32 %v1600_v14, %v99_v15 }
 0x108   :  { %v102_v17 = vmax.f32 %v100_v16, 0.0 }
 0x10a   :  { %v166_v20 = vadd.f32 %v163_v19, %v102_v17  ;;  %v1742_v19 = vmov 0  }
 0x10b   :  { %1554 = vset.pattern.permute.xlu1 %v1742_v19  ;;  %1553 = vset.pattern.permute.xlu2 %v1742_v19 }
 0x10c   :  { %v1795_v21 = vadd.f32 %v1601_v18, %v166_v20 }
 0x10e   :  { %1505 = vmatmul.msk.f32.vlgmr.msra.gmra.mxu3 %vm103_vm0, %v1795_v21 }
 0x191   :  { %v190_v24 = vpop.f32.mrf.mxu3 }
 0x192   :  { %v191_v25 = vadd.f32 %v1806_v23, %v190_v24 }
 0x194   :  { %v193_v26 = vmax.f32 %v191_v25, 0.0 }
 0x196   :  { %1506 = vmatmul.msk.f32.vlgmr.msrb.gmra.mxu0 %vm79_vm1, %v193_v26 }
 0x197   :  { %799 = vmatpush.msrb.mxu0 %v1780_v9 }
 0x199   :  { %800 = vmatpush.msrb.mxu0 %v1783_v10 }
 0x19b   :  { %801 = vmatpush.msrb.mxu0 %v1786_v11 }
 0x19d   :  { %802 = vmatpush.msrb.mxu0 %v1788_v12 }
 0x213   :  { %v214_v28 = vpop.f32.mrf.mxu0 }
 0x214   :  { %v215_v29 = vadd.f32 %v1814_v27, %v214_v28 }
 0x216   :  { %1605 = vtanh.f32 %v215_v29  ;;  %v1507_v31 = vmul.f32 -1.442695, %v215_v29 }
 0x218   :  { %1607 = vpow2.f32 %v1507_v31 }
 0x21c   :  { %v1606_v30 = vpop.eup %1605 }
 0x21d   :  { %239 = vrot.lane.b32.xlu1 %v1606_v30, %s1740_s21 }
 0x21e   :  { %v1608_v32 = vpop.eup %1607 }
 0x21f   :  { %v220_v33 = vadd.f32 1.0, %v1608_v32 }
 0x221   :  { %1609 = vrcp.f32 %v220_v33  ;;  %v232_v39 = vand.u32 2147483648, %v220_v33  ;;  %vm226_vm3 = vweird.f32 %v220_v33  ;;  %v230_v40 = vand.u32 2147483647, %v220_v33 }
 0x223   :  { %v233_v42 = vor.u32 1.1754944e-38, %v232_v39  ;;  %vm231_vm5 = vcmp.eq.f32.partialorder %v230_v40, 8.507059e+37 }
 0x227   :  { %v1610_v34 = vpop.eup %1609 }
 0x228   :  { %v222_v35 = vmul.f32 %v1610_v34, %v220_v33  ;;  %vm227_vm2 = vweird.f32 %v1610_v34  ;;  %v1859_v33 = vshrl.u32 %v133_v6, 7 }
 0x229   :  { %vm228_vm4 = vmor %vm226_vm3, %vm227_vm2 }
 0x22a   :  { %v223_v36 = vsub.f32 1.0, %v222_v35  ;;  %vm137_vm8 = vcmp.le.s32.totalorder %v1843_v7, %v1859_v33  ;;  %v1743_v35 = vmov 0.0  }
 0x22c   :  { %v224_v37 = vmul.f32 %v1610_v34, %v223_v36  ;;  %v1865_v36 = vsel %vm137_vm8, 1.0, %v1743_v35 }
 0x22e   :  { %v225_v38 = vadd.f32 %v1610_v34, %v224_v37 }
 0x230   :  { %v229_v41 = vsel %vm228_vm4, %v1610_v34, %v225_v38 }
 0x231   :  { %v234_v44 = vsel %vm231_vm5, %v233_v42, %v229_v41 }
 0x232   :  { %v237_v52 = vmul.f32 0.0, %v234_v44 }
 0x28f   :  { %v240_v43 = vpop.permute.xlu1 %239 }
 0x290   :  { %v242_v45 = vmul.f32 %v240_v43, %v234_v44 }
 0x292   :  { %244 = vrot.lane.b32.xlu1 %v242_v45, %s1741_s22 }
 0x304   :  { %v245_v53 = vpop.permute.xlu1 %244 }
 0x305   :  { %v1825_v54 = vadd.f32 %v245_v53, %v237_v52 }
 0x307   :  { %1611 = vtanh.f32 %v1825_v54 }
 0x30d   :  { %v1612_v55 = vpop.eup %1611 }
 0x30e   :  { %250 = vrot.lane.b32.xlu2 %v1612_v55, %s1741_s22 }
 0x368   :  { %v251_v56 = vpop.permute.xlu2 %250 }
 0x369   :  { %v1829_v57 = vmul.f32 %v251_v56, %v234_v44 }
 0x36b   :  { %v280_v58 = vperm.slane %v1829_v57, 0  ;;  %v279_v59 = vrot.slane %v1829_v57, 1 }
 0x36d   :  { %282 = vrot.lane.b32.xlu2 %v280_v58, %s1738_s0  ;;  %v281_v60 = vperm.slane %v279_v59, 0  ;;  %v65_v58 = vld [vmem:[#allocation5 + $0xa8] sm:$0xff]  ;;  %v64_v59 = vld [vmem:[#allocation5 + $0xa0] sm:$0xff] }
 0x36e   :  { %273 = vmatpush.msrb.mxu2 %v65_v58 }
 0x36f   :  { %284 = vrot.lane.b32.xlu0 %v281_v60, %s1738_s0 }
 0x370   :  { %274 = vmatpush.msrb.mxu2 %v64_v59 }
 0x372   :  { %572 = vmatpush.msra.mxu2 %v65_v58 }
 0x374   :  { %573 = vmatpush.msra.mxu2 %v64_v59 }
 0x3c7   :  { %v283_v62 = vpop.permute.xlu2 %282 }
 0x3c8   :  { %v288_v63 = vmul.f32 %v283_v62, %v1835_v61 }
 0x3ca   :  { %v290_v1 = vsel %vm79_vm1, %v288_v63, 0.0 }
 0x3cb   :  { %291 = vadd.xlane.f32.xlu1 %v290_v1 }
 0x3e1   :  { %v285_v3 = vpop.permute.xlu0 %284 }
 0x3e2   :  { %v289_v4 = vmul.f32 %v285_v3, %v1839_v2 }
 0x3e4   :  { %v293_v5 = vsel %vm79_vm1, %v289_v4, 0.0 }
 0x3e5   :  { %294 = vadd.xlane.f32.xlu2 %v293_v5 }
 0x43e   :  { %v1845_v8 = vpop.xlane.xlu1 %291 }
 0x43f   :  { %v298_v15 = vperm.slane %v1845_v8, %v1843_v7 }
 0x458   :  { %v1847_v14 = vpop.xlane.xlu2 %294 }
 0x459   :  { %v299_v16 = vperm.slane %v1847_v14, %v1843_v7 }
 0x45b   :  { %v301_v17 = vsel %vm300_vm6, %v299_v16, %v298_v15 }
 0x45c   :  { %v304_v18 = vsel %vm303_vm7, %v301_v17, -inf }
 0x45d   :  { %305 = vmax.xlane.f32.xlu0 %v304_v18 }
 0x4d0   :  { %v306_v20 = vpop.xlane.xlu0 %305 }
 0x4d1   :  { %v308_v24 = vperm.slane %v306_v20, 0  ;;  %v309_v25 = vperm.slane %v306_v20, 1 }
 0x4d3   :  { %v312_v26 = vsub.f32 %v1845_v8, %v308_v24  ;;  %v313_v28 = vsub.f32 %v1847_v14, %v309_v25 }
 0x4d5   :  { %v314_v29 = vmul.f32 1.442695, %v312_v26  ;;  %v316_v30 = vmul.f32 1.442695, %v313_v28 }
 0x4d7   :  { %1613 = vpow2.f32 %v314_v29 }
 0x4d8   :  { %1615 = vpow2.f32 %v316_v30 }
 0x4dd   :  { %v1614_v31 = vpop.eup %1613 }
 0x4de   :  { %v1616_v32 = vpop.eup %1615  ;;  %321 = vperm.xlu2 %1553, %v1614_v31  }
 0x4df   :  { %324 = vperm.xlu1 %1554, %v1616_v32  }
 0x4e7   :  { %1557 = vset.pattern.permute.xlu1 %v1859_v33 }
 0x538   :  { %v322_v34 = vpop.permute.xlu2 %321 }
 0x539   :  { %v326_v37 = vperm.slane %v322_v34, %v1843_v7 }
 0x53b   :  { %v353_v38 = vmul.f32 %v1865_v36, %v326_v37 }
 0x53d   :  { %v356_v39 = vsel %vm355_vm9, %v353_v38, 0.0  ;;  %v52_v38 = vld [vmem:[#allocation5 + $0x40] sm:$0xff] }
 0x53e   :  { %357 = vadd.xlane.f32.xlu2 %v356_v39 }
 0x551   :  { %v325_v40 = vpop.permute.xlu1 %324 }
 0x552   :  { %v327_v41 = vperm.slane %v325_v40, %v1843_v7 }
 0x554   :  { %v328_v42 = vsel %vm300_vm6, %v327_v41, %v326_v37  ;;  %v354_v43 = vmul.f32 %v1865_v36, %v327_v41  ;;  %v53_v37 = vld [vmem:[#allocation5 + $0x48] sm:$0xff] }
 0x555   :  { %v330_v44 = vsel %vm303_vm7, %v328_v42, 0.0  ;;  %460 = vmatpush.msrb.mxu3 %v53_v37 }
 0x556   :  { %331 = vadd.xlane.f32.xlu0 %v330_v44  ;;  %v359_v45 = vsel %vm355_vm9, %v354_v43, 0.0 }
 0x557   :  { %360 = vadd.xlane.f32.xlu1 %v359_v45  ;;  %461 = vmatpush.msrb.mxu3 %v52_v38 }
 0x559   :  { %776 = vmatpush.msra.mxu3 %v53_v37 }
 0x55b   :  { %777 = vmatpush.msra.mxu3 %v52_v38 }
 0x5b1   :  { %v358_v52 = vpop.xlane.xlu2 %357 }
 0x5c9   :  { %v332_v47 = vpop.xlane.xlu0 %331 }
 0x5ca   :  { %v362_v48 = vmul.f32 %v332_v47, %v1772_v0  ;;  %v361_v53 = vpop.xlane.xlu1 %360 }
 0x5cc   :  { %365 = vperm.xlu0 %1555, %v362_v48  }
 0x5d4   :  { %1556 = vset.pattern.permute.xlu0 %v1742_v19 }
 0x63e   :  { %v366_v49 = vpop.permute.xlu0 %365 }
 0x63f   :  { %v367_v50 = vperm.slane %v366_v49, 0  ;;  %v368_v51 = vperm.slane %v366_v49, 1 }
 0x641   :  { %vm372_vm10 = vcmp.lt.f32.partialorder %v361_v53, %v368_v51  ;;  %vm371_vm11 = vcmp.lt.f32.partialorder %v358_v52, %v367_v50 }
 0x642   :  { %v374_v55 = vsel %vm372_vm10, 1, %v1742_v19  ;;  %v373_v56 = vsel %vm371_vm11, 1, %v1742_v19  ;;  %vm401_vm10 = vcmp.eq.s32.totalorder %v1843_v7, 0 }
 0x643   :  { %379 = vperm.xlu2 %1553, %v374_v55   ;;  %376 = vperm.xlu0 %1556, %v373_v56  }
 0x64b   :  { %255 = vrot.lane.b32.xlu2 %v1829_v57, %s1738_s0  ;;  %1564 = vset.pattern.permute.xlu0 %v1859_v33 }
 0x64c   :  { %1563 = vset.pattern.permute.xlu2 %v1859_v33 }
 0x69d   :  { %v380_v60 = vpop.permute.xlu2 %379 }
 0x69e   :  { %v382_v1 = vperm.slane %v380_v60, %v1843_v7 }
 0x6a5   :  { %v256_v62 = vpop.permute.xlu2 %255 }
 0x6a6   :  { %1508 = vmatmul.msk.f32.vlgmr.msrb.gmra.mxu2 %vm79_vm1, %v256_v62 }
 0x6a7   :  { %887 = vmatpush.msrb.mxu2 %v65_v58 }
 0x6a9   :  { %888 = vmatpush.msrb.mxu2 %v64_v59 }
 0x6b5   :  { %v377_v63 = vpop.permute.xlu0 %376 }
 0x6b6   :  { %v381_v57 = vperm.slane %v377_v63, %v1843_v7 }
 0x6b8   :  { %v383_v3 = vsel %vm300_vm6, %v382_v1, %v381_v57  ;;  %v1910_v1 = vld [vmem:[#allocation5 + $0xb3] ss:$0 sm:$0xff] }
 0x6b9   :  { %v384_v4 = vsel %vm303_vm7, %v383_v3, 0 }
 0x6ba   :  { %v386_v5 = vshrl.u32 %v384_v4, 16  ;;  %v385_v6 = vand.u32 65535, %v384_v4 }
 0x6bc   :  { %v388_v15 = vcvt.s32.f32 %v386_v5  ;;  %v387_v16 = vcvt.s32.f32 %v385_v6 }
 0x6be   :  { %391 = vadd.xlane.f32.xlu1 %v388_v15  ;;  %389 = vadd.xlane.f32.xlu0 %v387_v16 }
 0x731   :  { %v392_v17 = vpop.xlane.xlu1 %391  ;;  %v390_v18 = vpop.xlane.xlu0 %389 }
 0x732   :  { %v394_v20 = vcvt.f32.s32 %v392_v17  ;;  %v393_v25 = vcvt.f32.s32 %v390_v18 }
 0x734   :  { %v395_v24 = vshll.u32 %v394_v20, 16 }
 0x736   :  { %v396_v26 = vadd.s32 %v395_v24, %v393_v25 }
 0x738   :  { %vm397_vm12 = vcmp.gt.s32.totalorder %v396_v26, 0 }
 0x739   :  { %v398_v28 = vsel %vm397_vm12, %v396_v26, 0  ;;  %vm716_vm12 = vcmp.eq.s32.totalorder %v1843_v7, 1 }
 0x73a   :  { %vm399_vm13 = vcmp.lt.s32.totalorder %v398_v28, 7 }
 0x73b   :  { %v1888_v29 = vsel %vm399_vm13, %v398_v28, 7 }
 0x73c   :  { %vm403_vm14 = vcmp.eq.s32.totalorder %v1843_v7, %v1888_v29 }
 0x73d   :  { %v1893_v30 = vsel %vm403_vm14, 1.0, %v1743_v35 }
 0x73e   :  { %v406_v31 = vperm.slane %v1893_v30, 0  ;;  %v413_v32 = vperm.slane %v1893_v30, 1 }
 0x740   :  { %v1558_v34 = vpack.i.bf16 %v413_v32, %v406_v31 }
 0x742   :  { %1559 = vperm.xlu1 %1557, %v1558_v34  }
 0x74a   :  { %1566 = vset.pattern.permute.xlu1 %v1742_v19 }
 0x7b4   :  { %v1560_v39 = vpop.permute.xlu1 %1559 }
 0x7b5   :  { %v1562_v40 = vunpack.i.h.bf16 %v1560_v39  ;;  %v1561_v41 = vunpack.i.l.bf16 %v1560_v39 }
 0x7b7   :  { %v421_v42 = vmul.f32 %v1562_v40, %v1839_v2  ;;  %v420_v43 = vmul.f32 %v1561_v41, %v1835_v61 }
 0x7b9   :  { %v429_v44 = vsel %vm79_vm1, %v421_v42, 0.0  ;;  %v422_v45 = vsel %vm79_vm1, %v420_v43, 0.0 }
 0x7ba   :  { %v430_v46 = vrot.slane %v429_v44, 4  ;;  %v423_v47 = vrot.slane %v422_v45, 4 }
 0x7bc   :  { %v431_v48 = vadd.f32 %v430_v46, %v429_v44  ;;  %v424_v49 = vadd.f32 %v423_v47, %v422_v45 }
 0x7be   :  { %v432_v50 = vrot.slane %v431_v48, 2  ;;  %v425_v51 = vrot.slane %v424_v49, 2 }
 0x7c0   :  { %v433_v52 = vadd.f32 %v432_v50, %v431_v48  ;;  %v426_v53 = vadd.f32 %v425_v51, %v424_v49 }
 0x7c2   :  { %v427_v55 = vrot.slane %v426_v53, 1  ;;  %v434_v56 = vrot.slane %v433_v52, 1 }
 0x7c4   :  { %v428_v58 = vadd.f32 %v427_v55, %v426_v53  ;;  %v435_v59 = vadd.f32 %v434_v56, %v433_v52 }
 0x7c6   :  { %v1902_v60 = vadd.f32 -0.125, %v428_v58  ;;  %v1904_v62 = vadd.f32 -0.125, %v435_v59 }
 0x7c8   :  { %v443_v63 = vsel %vm300_vm6, %v1904_v62, %v1902_v60 }
 0x7c9   :  { %1512 = vmatmul.msk.f32.vlgmr.msrb.gmra.mxu3 %vm79_vm1, %v443_v63 }
 0x7ca   :  { %1091 = vmatpush.msrb.mxu3 %v53_v37 }
 0x7cc   :  { %1092 = vmatpush.msrb.mxu3 %v52_v38 }
 0x84c   :  { %v463_v57 = vpop.f32.mrf.mxu3 }
 0x84d   :  { %v466_v3 = vadd.f32 %v463_v57, %v1795_v21  ;;  %v276_v21 = vpop.f32.mrf.mxu2 }
 0x84e   :  { %v277_v16 = vadd.f32 %v1814_v27, %v276_v21 }
 0x84f   :  { %v1914_v4 = vadd.f32 %v1910_v1, %v466_v3 }
 0x851   :  { %1513 = vmatmul.msk.f32.vlgmr.msra.gmra.mxu0 %vm103_vm0, %v1914_v4 }
 0x852   :  { %1114 = vmatpush.msra.mxu0 %v1780_v9 }
 0x854   :  { %1115 = vmatpush.msra.mxu0 %v1783_v10 }
 0x856   :  { %1116 = vmatpush.msra.mxu0 %v1786_v11 }
 0x858   :  { %1117 = vmatpush.msra.mxu0 %v1788_v12 }
 0x8ce   :  { %v489_v5 = vpop.f32.mrf.mxu0 }
 0x8cf   :  { %v490_v6 = vadd.f32 %v1806_v23, %v489_v5 }
 0x8d1   :  { %v492_v15 = vmax.f32 %v490_v6, 0.0 }
 0x8d3   :  { %1514 = vmatmul.msk.f32.vlgmr.msrb.gmra.mxu1 %vm79_vm1, %v492_v15 }
 0x8d4   :  { %1140 = vmatpush.msrb.mxu1 %v1792_v13 }
 0x8d6   :  { %1141 = vmatpush.msrb.mxu1 %v1799_v22 }
 0x950   :  { %v513_v9 = vpop.f32.mrf.mxu1 }
 0x951   :  { %v514_v17 = vadd.f32 %v513_v9, %v277_v16 }
 0x953   :  { %1617 = vtanh.f32 %v514_v17  ;;  %v1515_v11 = vmul.f32 -1.442695, %v514_v17 }
 0x955   :  { %1619 = vpow2.f32 %v1515_v11 }
 0x959   :  { %v1618_v10 = vpop.eup %1617 }
 0x95a   :  { %538 = vrot.lane.b32.xlu2 %v1618_v10, %s1740_s21 }
 0x95b   :  { %v1620_v12 = vpop.eup %1619 }
 0x95c   :  { %v519_v18 = vadd.f32 1.0, %v1620_v12 }
 0x95e   :  { %1621 = vrcp.f32 %v519_v18  ;;  %v531_v22 = vand.u32 2147483648, %v519_v18  ;;  %vm525_vm2 = vweird.f32 %v519_v18  ;;  %v529_v28 = vand.u32 2147483647, %v519_v18 }
 0x960   :  { %v532_v32 = vor.u32 1.1754944e-38, %v531_v22  ;;  %vm530_vm4 = vcmp.eq.f32.partialorder %v529_v28, 8.507059e+37 }
 0x964   :  { %v1622_v20 = vpop.eup %1621 }
 0x965   :  { %v521_v24 = vmul.f32 %v1622_v20, %v519_v18  ;;  %vm526_vm15 = vweird.f32 %v1622_v20 }
 0x966   :  { %vm527_vm3 = vmor %vm525_vm2, %vm526_vm15 }
 0x967   :  { %v522_v25 = vsub.f32 1.0, %v521_v24 }
 0x969   :  { %v523_v13 = vmul.f32 %v1622_v20, %v522_v25 }
 0x96b   :  { %v524_v26 = vadd.f32 %v1622_v20, %v523_v13 }
 0x96d   :  { %v528_v31 = vsel %vm527_vm3, %v1622_v20, %v524_v26 }
 0x96e   :  { %v533_v37 = vsel %vm530_vm4, %v532_v32, %v528_v31 }
 0x96f   :  { %v536_v39 = vmul.f32 %v533_v37, %v1825_v54  ;;  %v1941_v54 = vsub.f32 1.0, %v1893_v30 }
 0x971   :  { %v596_v48 = vperm.slane %v1941_v54, 0  ;;  %v603_v30 = vperm.slane %v1941_v54, 1 }
 0x9b4   :  { %v539_v34 = vpop.permute.xlu2 %538 }
 0x9b5   :  { %v541_v38 = vmul.f32 %v539_v34, %v533_v37 }
 0x9b7   :  { %543 = vrot.lane.b32.xlu1 %v541_v38, %s1741_s22 }
 0xa29   :  { %v544_v40 = vpop.permute.xlu1 %543 }
 0xa2a   :  { %v1930_v41 = vadd.f32 %v544_v40, %v536_v39  ;;  %v1745_v39 = vmov 81  }
 0xa2c   :  { %1623 = vtanh.f32 %v1930_v41 }
 0xa32   :  { %v1624_v42 = vpop.eup %1623 }
 0xa33   :  { %549 = vrot.lane.b32.xlu2 %v1624_v42, %s1741_s22 }
 0xa8d   :  { %v550_v43 = vpop.permute.xlu2 %549 }
 0xa8e   :  { %v1934_v44 = vmul.f32 %v550_v43, %v533_v37 }
 0xa90   :  { %v579_v45 = vperm.slane %v1934_v44, 0  ;;  %v578_v46 = vrot.slane %v1934_v44, 1 }
 0xa92   :  { %581 = vrot.lane.b32.xlu1 %v579_v45, %s1738_s0  ;;  %v580_v47 = vperm.slane %v578_v46, 0 }
 0xa94   :  { %583 = vrot.lane.b32.xlu2 %v580_v47, %s1738_s0 }
 0xa9c   :  { %601 = vperm.xlu2 %1563, %v596_v48  }
 0xaa4   :  { %1565 = vset.pattern.permute.xlu2 %v1742_v19 }
 0xaee   :  { %v584_v49 = vpop.permute.xlu2 %583 }
 0xaef   :  { %v588_v50 = vmul.f32 %v584_v49, %v1839_v2 }
 0xaf1   :  { %v592_v51 = vsel %vm79_vm1, %v588_v50, 0.0 }
 0xaf2   :  { %593 = vadd.xlane.f32.xlu1 %v592_v51 }
 0xaf6   :  { %v602_v56 = vpop.permute.xlu2 %601 }
 0xb04   :  { %v582_v52 = vpop.permute.xlu1 %581 }
 0xb05   :  { %v587_v53 = vmul.f32 %v582_v52, %v1835_v61 }
 0xb07   :  { %v589_v55 = vsel %vm79_vm1, %v587_v53, 0.0 }
 0xb08   :  { %590 = vadd.xlane.f32.xlu0 %v589_v55 }
 0xb1c   :  { %608 = vperm.xlu0 %1564, %v603_v30  }
 0xb24   :  { %1567 = vset.pattern.permute.xlu0 %v1742_v19 }
 0xb65   :  { %v594_v63 = vpop.xlane.xlu1 %593 }
 0xb7b   :  { %v591_v58 = vpop.xlane.xlu0 %590 }
 0xb7c   :  { %v1951_v59 = vmul.f32 %v602_v56, %v591_v58 }
 0xb7e   :  { %617 = vperm.xlu2 %1565, %v1951_v59  }
 0xb8e   :  { %v609_v57 = vpop.permute.xlu0 %608 }
 0xb8f   :  { %v1954_v3 = vmul.f32 %v609_v57, %v594_v63 }
 0xb91   :  { %620 = vperm.xlu2 %1565, %v1954_v3  }
 0xbd8   :  { %v618_v5 = vpop.permute.xlu2 %617 }
 0xbd9   :  { %v622_v15 = vperm.slane %v618_v5, %v1843_v7 }
 0xbeb   :  { %v621_v6 = vpop.permute.xlu2 %620 }
 0xbec   :  { %v623_v21 = vperm.slane %v621_v6, %v1843_v7 }
 0xbee   :  { %v624_v16 = vsel %vm300_vm6, %v623_v21, %v622_v15 }
 0xbef   :  { %v626_v9 = vsel %vm303_vm7, %v624_v16, -inf }
 0xbf0   :  { %627 = vmax.xlane.f32.xlu2 %v626_v9 }
 0xc63   :  { %v628_v17 = vpop.xlane.xlu2 %627 }
 0xc64   :  { %v630_v10 = vperm.slane %v628_v17, 0  ;;  %v631_v11 = vperm.slane %v628_v17, 1 }
 0xc66   :  { %v634_v12 = vsub.f32 %v1951_v59, %v630_v10  ;;  %v635_v18 = vsub.f32 %v1954_v3, %v631_v11 }
 0xc68   :  { %v636_v20 = vmul.f32 1.442695, %v634_v12  ;;  %v638_v24 = vmul.f32 1.442695, %v635_v18  ;;  %v402_v12 = vsel %vm401_vm10, %v1888_v29, 0 }
 0xc6a   :  { %1625 = vpow2.f32 %v636_v20 }
 0xc6b   :  { %1627 = vpow2.f32 %v638_v24 }
 0xc70   :  { %v1626_v25 = vpop.eup %1625 }
 0xc71   :  { %v1628_v13 = vpop.eup %1627  ;;  %643 = vperm.xlu1 %1566, %v1626_v25  }
 0xc72   :  { %646 = vperm.xlu0 %1567, %v1628_v13  }
 0xc79   :  { %1568 = vset.pattern.permute.xlu1 %v1745_v39 }
 0xc7a   :  { %1569 = vset.pattern.permute.xlu0 %v1859_v33 }
 0xce3   :  { %v644_v26 = vpop.permute.xlu1 %643 }
 0xce4   :  { %v647_v22 = vpop.permute.xlu0 %646  ;;  %v648_v28 = vperm.slane %v644_v26, %v1843_v7 }
 0xce5   :  { %v649_v31 = vperm.slane %v647_v22, %v1843_v7 }
 0xce6   :  { %v669_v32 = vmul.f32 %v1865_v36, %v648_v28 }
 0xce7   :  { %v650_v34 = vsel %vm300_vm6, %v649_v31, %v648_v28  ;;  %v670_v43 = vmul.f32 %v1865_v36, %v649_v31 }
 0xce8   :  { %v652_v37 = vsel %vm303_vm7, %v650_v34, 0.0  ;;  %v671_v38 = vsel %vm355_vm9, %v669_v32, 0.0 }
 0xce9   :  { %653 = vadd.xlane.f32.xlu0 %v652_v37  ;;  %672 = vadd.xlane.f32.xlu2 %v671_v38  ;;  %v674_v45 = vsel %vm355_vm9, %v670_v43, 0.0 }
 0xd5c   :  { %v654_v40 = vpop.xlane.xlu0 %653  ;;  %v673_v48 = vpop.xlane.xlu2 %672 }
 0xd5d   :  { %v677_v42 = vmul.f32 %v654_v40, %v1772_v0 }
 0xd5f   :  { %680 = vperm.xlu1 %1568, %v677_v42  }
 0xd67   :  { %1577 = vset.pattern.permute.xlu1 %v1742_v19 }
 0xd89   :  { %675 = vadd.xlane.f32.xlu1 %v674_v45 }
 0xda2   :  { %554 = vrot.lane.b32.xlu1 %v1934_v44, %s1738_s0 }
 0xdd1   :  { %v681_v46 = vpop.permute.xlu1 %680 }
 0xdd2   :  { %v682_v47 = vperm.slane %v681_v46, 0  ;;  %v683_v50 = vperm.slane %v681_v46, 1 }
 0xdd4   :  { %vm686_vm5 = vcmp.lt.f32.partialorder %v673_v48, %v682_v47 }
 0xdd5   :  { %v688_v49 = vsel %vm686_vm5, 1, %v1742_v19 }
 0xdd6   :  { %691 = vperm.xlu2 %1565, %v688_v49  }
 0xdfc   :  { %v676_v0 = vpop.xlane.xlu1 %675 }
 0xdfd   :  { %vm687_vm8 = vcmp.lt.f32.partialorder %v676_v0, %v683_v50 }
 0xdfe   :  { %v689_v51 = vsel %vm687_vm8, 1, %v1742_v19 }
 0xdff   :  { %694 = vperm.xlu2 %1565, %v689_v51  }
 0xe07   :  { %1575 = vset.pattern.permute.xlu2 %v1859_v33 }
 0xe14   :  { %v555_v52 = vpop.permute.xlu1 %554 }
 0xe15   :  { %1516 = vmatmul.msk.f32.vlgmr.msra.gmra.mxu2 %vm79_vm1, %v555_v52 }
 0xe30   :  { %v692_v53 = vpop.permute.xlu2 %691 }
 0xe31   :  { %v696_v55 = vperm.slane %v692_v53, %v1843_v7 }
 0xe59   :  { %v695_v44 = vpop.permute.xlu2 %694 }
 0xe5a   :  { %v697_v30 = vperm.slane %v695_v44, %v1843_v7 }
 0xe5c   :  { %v698_v56 = vsel %vm300_vm6, %v697_v30, %v696_v55 }
 0xe5d   :  { %v699_v58 = vsel %vm303_vm7, %v698_v56, 0 }
 0xe5e   :  { %v701_v63 = vshrl.u32 %v699_v58, 16  ;;  %v700_v57 = vand.u32 65535, %v699_v58 }
 0xe60   :  { %v703_v5 = vcvt.s32.f32 %v701_v63  ;;  %v702_v6 = vcvt.s32.f32 %v700_v57 }
 0xe62   :  { %706 = vadd.xlane.f32.xlu0 %v703_v5  ;;  %704 = vadd.xlane.f32.xlu2 %v702_v6 }
 0xe98   :  { %v575_v57 = vpop.f32.mrf.mxu2 }
 0xe99   :  { %v576_v5 = vadd.f32 %v1814_v27, %v575_v57 }
 0xed5   :  { %v707_v15 = vpop.xlane.xlu0 %706  ;;  %v705_v21 = vpop.xlane.xlu2 %704 }
 0xed6   :  { %v709_v16 = vcvt.f32.s32 %v707_v15  ;;  %v708_v17 = vcvt.f32.s32 %v705_v21 }
 0xed8   :  { %v710_v9 = vshll.u32 %v709_v16, 16 }
 0xeda   :  { %v711_v10 = vadd.s32 %v710_v9, %v708_v17 }
 0xedc   :  { %vm712_vm11 = vcmp.gt.s32.totalorder %v711_v10, 0 }
 0xedd   :  { %v713_v11 = vsel %vm712_vm11, %v711_v10, 0  ;;  %vm1031_vm11 = vcmp.eq.s32.totalorder %v1843_v7, 2 }
 0xede   :  { %vm714_vm13 = vcmp.lt.s32.totalorder %v713_v11, 7 }
 0xedf   :  { %v715_v18 = vsel %vm714_vm13, %v713_v11, 7 }
 0xee0   :  { %v1987_v20 = vsel %vm716_vm12, %v715_v18, %v402_v12  ;;  %vm718_vm14 = vcmp.eq.s32.totalorder %v1843_v7, %v715_v18 }
 0xee1   :  { %v1991_v24 = vsel %vm718_vm14, 1.0, %v1743_v35 }
 0xee2   :  { %v721_v25 = vperm.slane %v1991_v24, 0  ;;  %v728_v13 = vperm.slane %v1991_v24, 1 }
 0xee4   :  { %v1570_v26 = vpack.i.bf16 %v728_v13, %v721_v25 }
 0xee6   :  { %1571 = vperm.xlu0 %1569, %v1570_v26  }
 0xeee   :  { %1579 = vset.pattern.permute.xlu0 %v1742_v19 }
 0xf58   :  { %v1572_v22 = vpop.permute.xlu0 %1571 }
 0xf59   :  { %v1574_v28 = vunpack.i.h.bf16 %v1572_v22  ;;  %v1573_v31 = vunpack.i.l.bf16 %v1572_v22 }
 0xf5b   :  { %v736_v29 = vmul.f32 %v1574_v28, %v1839_v2  ;;  %v735_v32 = vmul.f32 %v1573_v31, %v1835_v61 }
 0xf5d   :  { %v744_v34 = vsel %vm79_vm1, %v736_v29, 0.0  ;;  %v737_v37 = vsel %vm79_vm1, %v735_v32, 0.0 }
 0xf5e   :  { %v745_v38 = vrot.slane %v744_v34, 4  ;;  %v738_v39 = vrot.slane %v737_v37, 4 }
 0xf60   :  { %v746_v40 = vadd.f32 %v745_v38, %v744_v34  ;;  %v739_v42 = vadd.f32 %v738_v39, %v737_v37  ;;  %v755_v34 = vsub.f32 1.0, %v1991_v24 }
 0xf62   :  { %v747_v43 = vrot.slane %v746_v40, 2  ;;  %v740_v45 = vrot.slane %v739_v42, 2  ;;  %v2026_v38 = vmul.f32 %v755_v34, %v1941_v54  ;;  %v1746_v34 = vmov 82  }
 0xf64   :  { %v748_v46 = vadd.f32 %v747_v43, %v746_v40  ;;  %v741_v47 = vadd.f32 %v740_v45, %v739_v42  ;;  %v911_v39 = vperm.slane %v2026_v38, 0  ;;  %v918_v40 = vperm.slane %v2026_v38, 1 }
 0xf66   :  { %v749_v48 = vrot.slane %v748_v46, 1  ;;  %v742_v49 = vrot.slane %v741_v47, 1 }
 0xf68   :  { %v743_v50 = vadd.f32 %v742_v49, %v741_v47  ;;  %v750_v0 = vadd.f32 %v749_v48, %v748_v46 }
 0xf6a   :  { %v2000_v51 = vadd.f32 -0.125, %v743_v50  ;;  %v2002_v52 = vadd.f32 -0.125, %v750_v0 }
 0xf6c   :  { %v759_v53 = vsel %vm300_vm6, %v2002_v52, %v2000_v51 }
 0xf6d   :  { %1520 = vmatmul.msk.f32.vlgmr.msra.gmra.mxu3 %vm79_vm1, %v759_v53 }
 0xff0   :  { %v779_v44 = vpop.f32.mrf.mxu3 }
 0xff1   :  { %v782_v55 = vadd.f32 %v779_v44, %v1914_v4 }
 0xff3   :  { %v2010_v30 = vadd.f32 %v1910_v1, %v782_v55 }
 0xff5   :  { %1521 = vmatmul.msk.f32.vlgmr.msrb.gmra.mxu0 %vm103_vm0, %v2010_v30 }
0x1072   :  { %v804_v56 = vpop.f32.mrf.mxu0 }
0x1073   :  { %v805_v58 = vadd.f32 %v1806_v23, %v804_v56 }
0x1075   :  { %v807_v63 = vmax.f32 %v805_v58, 0.0 }
0x1077   :  { %1522 = vmatmul.msk.f32.vlgmr.msra.gmra.mxu1 %vm79_vm1, %v807_v63 }
0x10f4   :  { %v828_v6 = vpop.f32.mrf.mxu1 }
0x10f5   :  { %v829_v15 = vadd.f32 %v828_v6, %v576_v5 }
0x10f7   :  { %1629 = vtanh.f32 %v829_v15  ;;  %v1523_v4 = vmul.f32 -1.442695, %v829_v15 }
0x10f9   :  { %1631 = vpow2.f32 %v1523_v4 }
0x10fd   :  { %v1630_v21 = vpop.eup %1629 }
0x10fe   :  { %853 = vrot.lane.b32.xlu1 %v1630_v21, %s1740_s21 }
0x10ff   :  { %v1632_v16 = vpop.eup %1631 }
0x1100   :  { %v834_v9 = vadd.f32 1.0, %v1632_v16 }
0x1102   :  { %1633 = vrcp.f32 %v834_v9  ;;  %v846_v18 = vand.u32 2147483648, %v834_v9  ;;  %vm840_vm2 = vweird.f32 %v834_v9  ;;  %v844_v27 = vand.u32 2147483647, %v834_v9 }
0x1104   :  { %v847_v13 = vor.u32 1.1754944e-38, %v846_v18  ;;  %vm845_vm4 = vcmp.eq.f32.partialorder %v844_v27, 8.507059e+37 }
0x1108   :  { %v1634_v17 = vpop.eup %1633 }
0x1109   :  { %v836_v10 = vmul.f32 %v1634_v17, %v834_v9  ;;  %vm841_vm15 = vweird.f32 %v1634_v17 }
0x110a   :  { %vm842_vm3 = vmor %vm840_vm2, %vm841_vm15 }
0x110b   :  { %v837_v23 = vsub.f32 1.0, %v836_v10 }
0x110d   :  { %v838_v11 = vmul.f32 %v1634_v17, %v837_v23 }
0x110f   :  { %v839_v12 = vadd.f32 %v1634_v17, %v838_v11 }
0x1111   :  { %v843_v25 = vsel %vm842_vm3, %v1634_v17, %v839_v12 }
0x1112   :  { %v848_v22 = vsel %vm845_vm4, %v847_v13, %v843_v25 }
0x1113   :  { %v851_v31 = vmul.f32 %v848_v22, %v1930_v41 }
0x1170   :  { %v854_v26 = vpop.permute.xlu1 %853 }
0x1171   :  { %v856_v28 = vmul.f32 %v854_v26, %v848_v22 }
0x1173   :  { %858 = vrot.lane.b32.xlu1 %v856_v28, %s1741_s22 }
0x11e5   :  { %v859_v29 = vpop.permute.xlu1 %858 }
0x11e6   :  { %v2020_v32 = vadd.f32 %v859_v29, %v851_v31 }
0x11e8   :  { %1635 = vtanh.f32 %v2020_v32 }
0x11ee   :  { %v1636_v37 = vpop.eup %1635 }
0x11ef   :  { %864 = vrot.lane.b32.xlu2 %v1636_v37, %s1741_s22 }
0x11f7   :  { %916 = vperm.xlu2 %1575, %v911_v39   ;;  %v2059_v39 = vld [vmem:[#allocation2] sm:$0x3] }
0x11ff   :  { %923 = vperm.xlu2 %1575, %v918_v40  }
0x1207   :  { %1576 = vset.pattern.permute.xlu2 %v1742_v19 }
0x1249   :  { %v865_v41 = vpop.permute.xlu2 %864 }
0x124a   :  { %v2031_v42 = vmul.f32 %v865_v41, %v848_v22 }
0x124c   :  { %v894_v43 = vperm.slane %v2031_v42, 0  ;;  %v893_v24 = vrot.slane %v2031_v42, 1 }
0x124e   :  { %896 = vrot.lane.b32.xlu0 %v894_v43, %s1738_s0  ;;  %v895_v45 = vperm.slane %v893_v24, 0 }
0x1250   :  { %898 = vrot.lane.b32.xlu1 %v895_v45, %s1738_s0 }
0x1251   :  { %v917_v0 = vpop.permute.xlu2 %916 }
0x1259   :  { %v924_v56 = vpop.permute.xlu2 %923 }
0x12c0   :  { %v897_v54 = vpop.permute.xlu0 %896 }
0x12c1   :  { %v902_v46 = vmul.f32 %v897_v54, %v1835_v61 }
0x12c2   :  { %v899_v47 = vpop.permute.xlu1 %898 }
0x12c3   :  { %v903_v48 = vmul.f32 %v899_v47, %v1839_v2  ;;  %v904_v49 = vsel %vm79_vm1, %v902_v46, 0.0 }
0x12c4   :  { %905 = vadd.xlane.f32.xlu0 %v904_v49 }
0x12c5   :  { %v907_v50 = vsel %vm79_vm1, %v903_v48, 0.0 }
0x12c6   :  { %908 = vadd.xlane.f32.xlu1 %v907_v50 }
0x1337   :  { %v906_v53 = vpop.xlane.xlu0 %905 }
0x1338   :  { %v2041_v44 = vmul.f32 %v917_v0, %v906_v53 }
0x1339   :  { %v909_v55 = vpop.xlane.xlu1 %908 }
0x133a   :  { %932 = vperm.xlu2 %1576, %v2041_v44   ;;  %v2044_v58 = vmul.f32 %v924_v56, %v909_v55 }
0x1342   :  { %935 = vperm.xlu2 %1576, %v2044_v58  }
0x1394   :  { %v933_v63 = vpop.permute.xlu2 %932 }
0x1395   :  { %v937_v5 = vperm.slane %v933_v63, %v1843_v7 }
0x139c   :  { %v936_v57 = vpop.permute.xlu2 %935 }
0x139d   :  { %v938_v6 = vperm.slane %v936_v57, %v1843_v7 }
0x139f   :  { %v939_v15 = vsel %vm300_vm6, %v938_v6, %v937_v5 }
0x13a0   :  { %v941_v21 = vsel %vm303_vm7, %v939_v15, -inf }
0x13a1   :  { %942 = vmax.xlane.f32.xlu0 %v941_v21 }
0x1414   :  { %v943_v4 = vpop.xlane.xlu0 %942 }
0x1415   :  { %v945_v16 = vperm.slane %v943_v4, 0  ;;  %v946_v9 = vperm.slane %v943_v4, 1 }
0x1417   :  { %v949_v17 = vsub.f32 %v2041_v44, %v945_v16  ;;  %v950_v10 = vsub.f32 %v2044_v58, %v946_v9 }
0x1419   :  { %v951_v23 = vmul.f32 1.442695, %v949_v17  ;;  %v953_v11 = vmul.f32 1.442695, %v950_v10 }
0x141b   :  { %1637 = vpow2.f32 %v951_v23 }
0x141c   :  { %1639 = vpow2.f32 %v953_v11 }
0x1421   :  { %v1638_v12 = vpop.eup %1637 }
0x1422   :  { %v1640_v18 = vpop.eup %1639  ;;  %958 = vperm.xlu2 %1576, %v1638_v12  }
0x1423   :  { %961 = vperm.xlu1 %1577, %v1640_v18  }
0x142a   :  { %1578 = vset.pattern.permute.xlu2 %v1746_v34 }
0x147c   :  { %v959_v27 = vpop.permute.xlu2 %958 }
0x147d   :  { %v963_v13 = vperm.slane %v959_v27, %v1843_v7 }
0x147f   :  { %v984_v31 = vmul.f32 %v1865_v36, %v963_v13 }
0x1481   :  { %v986_v29 = vsel %vm355_vm9, %v984_v31, 0.0 }
0x1495   :  { %v962_v25 = vpop.permute.xlu1 %961 }
0x1496   :  { %v964_v26 = vperm.slane %v962_v25, %v1843_v7 }
0x1498   :  { %v965_v22 = vsel %vm300_vm6, %v964_v26, %v963_v13  ;;  %v985_v41 = vmul.f32 %v1865_v36, %v964_v26 }
0x1499   :  { %v967_v28 = vsel %vm303_vm7, %v965_v22, 0.0 }
0x149a   :  { %968 = vadd.xlane.f32.xlu0 %v967_v28  ;;  %v989_v43 = vsel %vm355_vm9, %v985_v41, 0.0 }
0x14a2   :  { %987 = vadd.xlane.f32.xlu0 %v986_v29 }
0x150d   :  { %v969_v37 = vpop.xlane.xlu0 %968 }
0x150e   :  { %v992_v40 = vmul.f32 %v2059_v39, %v969_v37 }
0x1510   :  { %995 = vperm.xlu2 %1578, %v992_v40  }
0x1515   :  { %v988_v54 = vpop.xlane.xlu0 %987 }
0x1518   :  { %1588 = vset.pattern.permute.xlu2 %v1742_v19 }
0x1539   :  { %990 = vadd.xlane.f32.xlu2 %v989_v43 }
0x156a   :  { %v996_v24 = vpop.permute.xlu2 %995 }
0x156b   :  { %v997_v45 = vperm.slane %v996_v24, 0  ;;  %v998_v47 = vperm.slane %v996_v24, 1 }
0x156d   :  { %vm1001_vm5 = vcmp.lt.f32.partialorder %v988_v54, %v997_v45 }
0x156e   :  { %v1003_v46 = vsel %vm1001_vm5, 1, %v1742_v19 }
0x156f   :  { %1006 = vperm.xlu0 %1579, %v1003_v46  }
0x1577   :  { %1580 = vset.pattern.permute.xlu0 %v1859_v33 }
0x15ac   :  { %v991_v48 = vpop.xlane.xlu2 %990 }
0x15ad   :  { %vm1002_vm8 = vcmp.lt.f32.partialorder %v991_v48, %v998_v47 }
0x15ae   :  { %v1004_v49 = vsel %vm1002_vm8, 1, %v1742_v19 }
0x15af   :  { %1009 = vperm.xlu1 %1577, %v1004_v49  }
0x15b7   :  { %1586 = vset.pattern.permute.xlu1 %v1859_v33 }
0x15e1   :  { %v1007_v50 = vpop.permute.xlu0 %1006 }
0x15e2   :  { %v1011_v53 = vperm.slane %v1007_v50, %v1843_v7 }
0x1621   :  { %v1010_v0 = vpop.permute.xlu1 %1009 }
0x1622   :  { %v1012_v55 = vperm.slane %v1010_v0, %v1843_v7  ;;  %v753_v0 = vadd.f32 %v2000_v51, %v1902_v60  ;;  %v1654_v51 = vld [vmem:[#allocation5 + $0xb4] ss:$0 sm:$0xff] }
0x1624   :  { %v1013_v56 = vsel %vm300_vm6, %v1012_v55, %v1011_v53  ;;  %v754_v53 = vadd.f32 %v2002_v52, %v1904_v62 }
0x1625   :  { %v1014_v63 = vsel %vm303_vm7, %v1013_v56, 0 }
0x1626   :  { %v1016_v57 = vshrl.u32 %v1014_v63, 16  ;;  %v1015_v5 = vand.u32 65535, %v1014_v63 }
0x1628   :  { %v1018_v6 = vcvt.s32.f32 %v1016_v57  ;;  %v1017_v15 = vcvt.s32.f32 %v1015_v5 }
0x162a   :  { %1021 = vadd.xlane.f32.xlu1 %v1018_v6  ;;  %1019 = vadd.xlane.f32.xlu2 %v1017_v15 }
0x1642   :  { %869 = vrot.lane.b32.xlu2 %v2031_v42, %s1738_s0 }
0x169d   :  { %v1022_v21 = vpop.xlane.xlu1 %1021  ;;  %v1020_v4 = vpop.xlane.xlu2 %1019 }
0x169e   :  { %v1024_v16 = vcvt.f32.s32 %v1022_v21  ;;  %v1023_v17 = vcvt.f32.s32 %v1020_v4 }
0x16a0   :  { %v1025_v9 = vshll.u32 %v1024_v16, 16  ;;  %v1655_v16 = vld [vmem:[#allocation5 + $0xb5] ss:$0 sm:$0xff] }
0x16a2   :  { %v1026_v10 = vadd.s32 %v1025_v9, %v1023_v17 }
0x16a4   :  { %vm1027_vm10 = vcmp.gt.s32.totalorder %v1026_v10, 0 }
0x16a5   :  { %v1028_v23 = vsel %vm1027_vm10, %v1026_v10, 0  ;;  %v870_v11 = vpop.permute.xlu2 %869 }
0x16a6   :  { %vm1029_vm12 = vcmp.lt.s32.totalorder %v1028_v23, 7  ;;  %1524 = vmatmul.msk.f32.vlgmr.msrb.gmra.mxu2 %vm79_vm1, %v870_v11 }
0x16a7   :  { %v1030_v12 = vsel %vm1029_vm12, %v1028_v23, 7  ;;  %vm1474_vm12 = vcmask 195584  }
0x16a8   :  { %v2078_v18 = vsel %vm1031_vm11, %v1030_v12, %v1987_v20  ;;  %vm1033_vm13 = vcmp.eq.s32.totalorder %v1843_v7, %v1030_v12  ;;  %vm1322_vm11 = vcmp.eq.s32.totalorder %v1843_v7, 3 }
0x16a9   :  { %v2082_v42 = vsel %vm1033_vm13, 1.0, %v1743_v35  ;;  %vm1477_vm13 = vcmask 523264  }
0x16aa   :  { %v1036_v27 = vperm.slane %v2082_v42, 0  ;;  %v1043_v25 = vperm.slane %v2082_v42, 1 }
0x16ac   :  { %v1581_v13 = vpack.i.bf16 %v1043_v25, %v1036_v27 }
0x16ae   :  { %1582 = vperm.xlu0 %1580, %v1581_v13  }
0x16b6   :  { %1589 = vset.pattern.permute.xlu0 %v1742_v19 }
0x1720   :  { %v1583_v26 = vpop.permute.xlu0 %1582 }
0x1721   :  { %v1585_v22 = vunpack.i.h.bf16 %v1583_v26  ;;  %v1584_v28 = vunpack.i.l.bf16 %v1583_v26 }
0x1723   :  { %v1051_v31 = vmul.f32 %v1585_v22, %v1839_v2  ;;  %v1050_v20 = vmul.f32 %v1584_v28, %v1835_v61 }
0x1725   :  { %v1059_v29 = vsel %vm79_vm1, %v1051_v31, 0.0  ;;  %v1052_v34 = vsel %vm79_vm1, %v1050_v20, 0.0 }
0x1726   :  { %v1060_v37 = vrot.slane %v1059_v29, 4  ;;  %v1053_v40 = vrot.slane %v1052_v34, 4 }
0x1728   :  { %v1061_v41 = vadd.f32 %v1060_v37, %v1059_v29  ;;  %v1054_v43 = vadd.f32 %v1053_v40, %v1052_v34  ;;  %v1070_v40 = vsub.f32 1.0, %v2082_v42 }
0x1729   :  { %v890_v4 = vpop.f32.mrf.mxu2 }
0x172a   :  { %v1062_v24 = vrot.slane %v1061_v41, 2  ;;  %v1055_v45 = vrot.slane %v1054_v43, 2  ;;  %v891_v9 = vadd.f32 %v1655_v16, %v890_v4 }
0x172c   :  { %v1063_v54 = vadd.f32 %v1062_v24, %v1061_v41  ;;  %v1056_v46 = vadd.f32 %v1055_v45, %v1054_v43  ;;  %v1071_v41 = vmul.f32 %v1070_v40, %v2026_v38 }
0x172e   :  { %v1064_v47 = vrot.slane %v1063_v54, 1  ;;  %v1057_v48 = vrot.slane %v1056_v46, 1  ;;  %v1202_v43 = vperm.slane %v1071_v41, 0  ;;  %v1209_v24 = vperm.slane %v1071_v41, 1 }
0x172f   :  { %v1747_v41 = vmov 83  }
0x1730   :  { %v1058_v49 = vadd.f32 %v1057_v48, %v1056_v46  ;;  %v1065_v50 = vadd.f32 %v1064_v47, %v1063_v54 }
0x1732   :  { %v1526_v55 = vadd.f32 -0.125, %v1058_v49  ;;  %v1527_v56 = vadd.f32 -0.125, %v1065_v50 }
0x1734   :  { %v1074_v63 = vsel %vm300_vm6, %v1527_v56, %v1526_v55  ;;  %v2096_v57 = vadd.f32 %v1526_v55, %v753_v0  ;;  %v2098_v5 = vadd.f32 %v1527_v56, %v754_v53 }
0x1735   :  { %1528 = vmatmul.msk.f32.vlgmr.msrb.gmra.mxu3 %vm79_vm1, %v1074_v63 }
0x17b8   :  { %v1094_v6 = vpop.f32.mrf.mxu3 }
0x17b9   :  { %v1097_v15 = vadd.f32 %v1094_v6, %v2010_v30 }
0x17bb   :  { %v1098_v21 = vadd.f32 %v1910_v1, %v1097_v15 }
0x17bd   :  { %1529 = vmatmul.msk.f32.vlgmr.msra.gmra.mxu0 %vm103_vm0, %v1098_v21 }
0x183a   :  { %v1119_v60 = vpop.f32.mrf.mxu0 }
0x183b   :  { %v1120_v62 = vadd.f32 %v1654_v51, %v1119_v60 }
0x183d   :  { %v1122_v52 = vmax.f32 %v1120_v62, 0.0 }
0x183f   :  { %1530 = vmatmul.msk.f32.vlgmr.msrb.gmra.mxu1 %vm79_vm1, %v1122_v52 }
0x18bc   :  { %v1143_v17 = vpop.f32.mrf.mxu1 }
0x18bd   :  { %v1144_v10 = vadd.f32 %v1143_v17, %v891_v9 }
0x18bf   :  { %1641 = vtanh.f32 %v1144_v10  ;;  %v1531_v30 = vmul.f32 -1.442695, %v1144_v10 }
0x18c1   :  { %1643 = vpow2.f32 %v1531_v30 }
0x18c5   :  { %v1642_v23 = vpop.eup %1641 }
0x18c6   :  { %1168 = vrot.lane.b32.xlu0 %v1642_v23, %s1740_s21 }
0x18c7   :  { %v1644_v1 = vpop.eup %1643 }
0x18c8   :  { %v1149_v11 = vadd.f32 1.0, %v1644_v1 }
0x18ca   :  { %1645 = vrcp.f32 %v1149_v11  ;;  %v1161_v22 = vand.u32 2147483648, %v1149_v11  ;;  %vm1155_vm15 = vweird.f32 %v1149_v11  ;;  %v1159_v28 = vand.u32 2147483647, %v1149_v11 }
0x18cc   :  { %v1162_v20 = vor.u32 1.1754944e-38, %v1161_v22  ;;  %vm1160_vm3 = vcmp.eq.f32.partialorder %v1159_v28, 8.507059e+37 }
0x18d0   :  { %v1646_v12 = vpop.eup %1645 }
0x18d1   :  { %v1151_v27 = vmul.f32 %v1646_v12, %v1149_v11  ;;  %vm1156_vm14 = vweird.f32 %v1646_v12 }
0x18d2   :  { %vm1157_vm2 = vmor %vm1155_vm15, %vm1156_vm14  ;;  %vm1479_vm14 = vcmask 556032  }
0x18d3   :  { %v1152_v25 = vsub.f32 1.0, %v1151_v27 }
0x18d5   :  { %v1153_v13 = vmul.f32 %v1646_v12, %v1152_v25 }
0x18d7   :  { %v1154_v26 = vadd.f32 %v1646_v12, %v1153_v13 }
0x18d9   :  { %v1158_v31 = vsel %vm1157_vm2, %v1646_v12, %v1154_v26 }
0x18da   :  { %v1163_v34 = vsel %vm1160_vm3, %v1162_v20, %v1158_v31 }
0x18db   :  { %v1166_v45 = vmul.f32 %v1163_v34, %v2020_v32 }
0x1938   :  { %v1169_v29 = vpop.permute.xlu0 %1168 }
0x1939   :  { %v1171_v37 = vmul.f32 %v1169_v29, %v1163_v34 }
0x193b   :  { %1173 = vrot.lane.b32.xlu1 %v1171_v37, %s1741_s22 }
0x1943   :  { %1207 = vperm.xlu1 %1586, %v1202_v43  }
0x194b   :  { %1214 = vperm.xlu1 %1586, %v1209_v24  }
0x1953   :  { %1587 = vset.pattern.permute.xlu1 %v1742_v19 }
0x19ad   :  { %v1174_v54 = vpop.permute.xlu1 %1173 }
0x19ae   :  { %v1176_v46 = vadd.f32 %v1174_v54, %v1166_v45 }
0x19b0   :  { %1647 = vtanh.f32 %v1176_v46 }
0x19b5   :  { %v1208_v6 = vpop.permute.xlu1 %1207 }
0x19b6   :  { %v1648_v47 = vpop.eup %1647 }
0x19b7   :  { %1179 = vrot.lane.b32.xlu0 %v1648_v47, %s1741_s22 }
0x19bd   :  { %v1215_v60 = vpop.permute.xlu1 %1214 }
0x1a29   :  { %v1180_v48 = vpop.permute.xlu0 %1179 }
0x1a2a   :  { %v1182_v42 = vmul.f32 %v1180_v48, %v1163_v34 }
0x1a2c   :  { %v1184_v49 = vrot.slane %v1182_v42, 1  ;;  %v1185_v50 = vperm.slane %v1182_v42, 0 }
0x1a2e   :  { %v1186_v0 = vperm.slane %v1184_v49, 0  ;;  %1187 = vrot.lane.b32.xlu2 %v1185_v50, %s1738_s0 }
0x1a30   :  { %1189 = vrot.lane.b32.xlu0 %v1186_v0, %s1738_s0 }
0x1a88   :  { %v1188_v38 = vpop.permute.xlu2 %1187 }
0x1a89   :  { %v1193_v53 = vmul.f32 %v1188_v38, %v1835_v61  ;;  %v1748_v38 = vmov 84  }
0x1a8b   :  { %v1195_v32 = vsel %vm79_vm1, %v1193_v53, 0.0 }
0x1a8c   :  { %1196 = vadd.xlane.f32.xlu2 %v1195_v32 }
0x1aa2   :  { %v1190_v55 = vpop.permute.xlu0 %1189 }
0x1aa3   :  { %v1194_v56 = vmul.f32 %v1190_v55, %v1839_v2 }
0x1aa5   :  { %v1198_v63 = vsel %vm79_vm1, %v1194_v56, 0.0 }
0x1aa6   :  { %1199 = vadd.xlane.f32.xlu0 %v1198_v63 }
0x1aff   :  { %v1197_v15 = vpop.xlane.xlu2 %1196 }
0x1b00   :  { %v2118_v21 = vmul.f32 %v1208_v6, %v1197_v15 }
0x1b02   :  { %1223 = vperm.xlu1 %1587, %v2118_v21  }
0x1b19   :  { %v1200_v51 = vpop.xlane.xlu0 %1199 }
0x1b1a   :  { %v2121_v62 = vmul.f32 %v1215_v60, %v1200_v51 }
0x1b1c   :  { %1226 = vperm.xlu1 %1587, %v2121_v62  }
0x1b24   :  { %1590 = vset.pattern.permute.xlu1 %v1747_v41 }
0x1b74   :  { %v1224_v52 = vpop.permute.xlu1 %1223 }
0x1b75   :  { %v1228_v16 = vperm.slane %v1224_v52, %v1843_v7 }
0x1b8e   :  { %v1227_v4 = vpop.permute.xlu1 %1226 }
0x1b8f   :  { %v1229_v9 = vperm.slane %v1227_v4, %v1843_v7 }
0x1b91   :  { %v1230_v17 = vsel %vm300_vm6, %v1229_v9, %v1228_v16 }
0x1b92   :  { %v1232_v10 = vsel %vm303_vm7, %v1230_v17, -inf }
0x1b93   :  { %1233 = vmax.xlane.f32.xlu1 %v1232_v10 }
0x1c06   :  { %v1234_v23 = vpop.xlane.xlu1 %1233 }
0x1c07   :  { %v1236_v30 = vperm.slane %v1234_v23, 0  ;;  %v1237_v1 = vperm.slane %v1234_v23, 1 }
0x1c09   :  { %v1240_v11 = vsub.f32 %v2118_v21, %v1236_v30  ;;  %v1241_v12 = vsub.f32 %v2121_v62, %v1237_v1 }
0x1c0b   :  { %v1242_v27 = vmul.f32 1.442695, %v1240_v11  ;;  %v1244_v25 = vmul.f32 1.442695, %v1241_v12 }
0x1c0d   :  { %1649 = vpow2.f32 %v1242_v27 }
0x1c0e   :  { %1651 = vpow2.f32 %v1244_v25 }
0x1c13   :  { %v1650_v13 = vpop.eup %1649 }
0x1c14   :  { %v1652_v26 = vpop.eup %1651  ;;  %1249 = vperm.xlu2 %1588, %v1650_v13  }
0x1c15   :  { %1252 = vperm.xlu0 %1589, %v1652_v26  }
0x1c6e   :  { %v1250_v22 = vpop.permute.xlu2 %1249 }
0x1c6f   :  { %v1254_v28 = vperm.slane %v1250_v22, %v1843_v7 }
0x1c71   :  { %v1275_v31 = vmul.f32 %v1865_v36, %v1254_v28 }
0x1c73   :  { %v1277_v20 = vsel %vm355_vm9, %v1275_v31, 0.0 }
0x1c74   :  { %1278 = vadd.xlane.f32.xlu0 %v1277_v20 }
0x1c87   :  { %v1253_v29 = vpop.permute.xlu0 %1252 }
0x1c88   :  { %v1255_v34 = vperm.slane %v1253_v29, %v1843_v7 }
0x1c8a   :  { %v1256_v37 = vsel %vm300_vm6, %v1255_v34, %v1254_v28  ;;  %v1276_v45 = vmul.f32 %v1865_v36, %v1255_v34 }
0x1c8b   :  { %v1258_v40 = vsel %vm303_vm7, %v1256_v37, 0.0 }
0x1c8c   :  { %1259 = vadd.xlane.f32.xlu2 %v1258_v40  ;;  %v1280_v54 = vsel %vm355_vm9, %v1276_v45, 0.0 }
0x1ce7   :  { %v1279_v48 = vpop.xlane.xlu0 %1278 }
0x1cff   :  { %v1260_v43 = vpop.xlane.xlu2 %1259 }
0x1d00   :  { %v1283_v24 = vmul.f32 %v2059_v39, %v1260_v43 }
0x1d02   :  { %1286 = vperm.xlu1 %1590, %v1283_v24  }
0x1d0a   :  { %1597 = vset.pattern.permute.xlu1 %v1748_v38 }
0x1d2c   :  { %1281 = vadd.xlane.f32.xlu1 %v1280_v54 }
0x1d74   :  { %v1287_v46 = vpop.permute.xlu1 %1286 }
0x1d75   :  { %v1288_v47 = vperm.slane %v1287_v46, 0  ;;  %v1289_v49 = vperm.slane %v1287_v46, 1 }
0x1d77   :  { %vm1292_vm4 = vcmp.lt.f32.partialorder %v1279_v48, %v1288_v47 }
0x1d78   :  { %v1294_v42 = vsel %vm1292_vm4, 1, %v1742_v19 }
0x1d79   :  { %1297 = vperm.xlu2 %1588, %v1294_v42  }
0x1d9f   :  { %v1282_v50 = vpop.xlane.xlu1 %1281 }
0x1da0   :  { %vm1293_vm5 = vcmp.lt.f32.partialorder %v1282_v50, %v1289_v49 }
0x1da1   :  { %v1295_v0 = vsel %vm1293_vm5, 1, %v1742_v19 }
0x1da2   :  { %1300 = vperm.xlu0 %1589, %v1295_v0  }
0x1daa   :  { %1591 = vset.pattern.permute.xlu0 %v1859_v33 }
0x1dd3   :  { %v1298_v36 = vpop.permute.xlu2 %1297 }
0x1dd4   :  { %v1302_v32 = vperm.slane %v1298_v36, %v1843_v7 }
0x1e14   :  { %v1301_v53 = vpop.permute.xlu0 %1300 }
0x1e15   :  { %v1303_v55 = vperm.slane %v1301_v53, %v1843_v7 }
0x1e17   :  { %v1304_v56 = vsel %vm300_vm6, %v1303_v55, %v1302_v32 }
0x1e18   :  { %v1305_v63 = vsel %vm303_vm7, %v1304_v56, 0 }
0x1e19   :  { %v1307_v6 = vshrl.u32 %v1305_v63, 16  ;;  %v1306_v15 = vand.u32 65535, %v1305_v63 }
0x1e1b   :  { %v1309_v60 = vcvt.s32.f32 %v1307_v6  ;;  %v1308_v51 = vcvt.s32.f32 %v1306_v15 }
0x1e1d   :  { %1312 = vadd.xlane.f32.xlu2 %v1309_v60  ;;  %1310 = vadd.xlane.f32.xlu1 %v1308_v51 }
0x1e36   :  { %1399 = vperm.xlu1 %1597, %v2059_v39  }
0x1e3e   :  { %1599 = vset.pattern.permute.xlu1 %v1742_v19 }
0x1e90   :  { %v1313_v33 = vpop.xlane.xlu2 %1312  ;;  %v1311_v52 = vpop.xlane.xlu1 %1310 }
0x1e91   :  { %v1315_v4 = vcvt.f32.s32 %v1313_v33  ;;  %v1314_v9 = vcvt.f32.s32 %v1311_v52 }
0x1e93   :  { %v1316_v16 = vshll.u32 %v1315_v4, 16 }
0x1e95   :  { %v1317_v17 = vadd.s32 %v1316_v16, %v1314_v9 }
0x1e97   :  { %vm1318_vm8 = vcmp.gt.s32.totalorder %v1317_v17, 0 }
0x1e98   :  { %v1319_v10 = vsel %vm1318_vm8, %v1317_v17, 0 }
0x1e99   :  { %vm1320_vm10 = vcmp.lt.s32.totalorder %v1319_v10, 7 }
0x1e9a   :  { %v1321_v23 = vsel %vm1320_vm10, %v1319_v10, 7 }
0x1e9b   :  { %vm1324_vm7 = vcmp.eq.s32.totalorder %v1843_v7, %v1321_v23 }
0x1e9c   :  { %v1532_v30 = vsel %vm1324_vm7, 1.0, %v1743_v35  ;;  %v68_v35 = vld [vmem:[#allocation5 + $0xb2] sm:$0x1] }
0x1e9d   :  { %v1327_v1 = vperm.slane %v1532_v30, 0  ;;  %v1334_v11 = vperm.slane %v1532_v30, 1  ;;  %v1391_v34 = vmul.f32 4.0, %v68_v35  ;;  %v1463_v30 = vadd.s32 4294967272, %v1843_v7 }
0x1e9f   :  { %v1592_v12 = vpack.i.bf16 %v1334_v11, %v1327_v1 }
0x1ea1   :  { %1593 = vperm.xlu0 %1591, %v1592_v12  }
0x1ea8   :  { %v2150_v27 = vpop.permute.xlu1 %1399 }
0x1ea9   :  { %v1401_v25 = vperm.slane %v2150_v27, 0  ;;  %v1402_v13 = vperm.slane %v2150_v27, 1  ;;  %1598 = vset.pattern.permute.xlu0 %v1742_v19  ;;  %v1392_v19 = vperm.slane %v1391_v34, 0 }
0x1eab   :  { %v1406_v26 = vmul.f32 %v1402_v13, %v1847_v14  ;;  %v1407_v22 = vmul.f32 %v1401_v25, %v1951_v59  ;;  %v1405_v28 = vmul.f32 %v1401_v25, %v1845_v8  ;;  %v1411_v31 = vmul.f32 %v1401_v25, %v2118_v21  ;;  %v50_v21 = vld [vmem:[#allocation5 + $0x30] sm:$0xff] }
0x1eac   :  { %v1409_v20 = vmul.f32 %v1401_v25, %v2041_v44  ;;  %v1408_v29 = vmul.f32 %v1402_v13, %v1954_v3  ;;  %v1410_v14 = vmul.f32 %v1402_v13, %v2044_v58  ;;  %v1323_v8 = vsel %vm1322_vm11, %v1321_v23, %v2078_v18  ;;  %v51_v3 = vld [vmem:[#allocation5 + $0x38] sm:$0xff] }
0x1ead   :  { %1423 = vperm.xlu2 %1588, %v1406_v26   ;;  %1432 = vperm.xlu1 %1599, %v1407_v22   ;;  %v1415_v59 = vcvt.s32.f32 %v1323_v8  ;;  %v1412_v6 = vmul.f32 %v1402_v13, %v2121_v62 }
0x1eae   :  { %1420 = vperm.xlu0 %1598, %v1405_v28   ;;  %1380 = vmatpush.msra.mxu2 %v51_v3 }
0x1eaf   :  { %v1416_v44 = vmul.f32 %v1415_v59, %v2150_v27 }
0x1eb0   :  { %1381 = vmatpush.msra.mxu2 %v50_v21 }
0x1eb5   :  { %1458 = vperm.xlu2 %1588, %v1411_v31   ;;  %1445 = vperm.xlu1 %1599, %v1409_v20  }
0x1eb6   :  { %1435 = vperm.xlu0 %1598, %v1408_v29  }
0x1ebd   :  { %1394 = vrot.lane.b32.xlu1 %v1392_v19, %s1749_s23 }
0x1ebe   :  { %1448 = vperm.xlu0 %1598, %v1410_v14  }
0x1ec5   :  { %1469 = vrot.lane.b32.xlu1 %v1416_v44, %s1739_s1 }
0x1f07   :  { %v1424_v4 = vpop.permute.xlu2 %1423 }
0x1f08   :  { %v1426_v25 = vperm.slane %v1424_v4, %v1843_v7 }
0x1f0f   :  { %v1459_v11 = vpop.permute.xlu2 %1458 }
0x1f10   :  { %v1464_v35 = vperm.slane %v1459_v11, %v1463_v30 }
0x1f13   :  { %v1594_v37 = vpop.permute.xlu0 %1593 }
0x1f14   :  { %v1596_v40 = vunpack.i.h.bf16 %v1594_v37  ;;  %v1595_v41 = vunpack.i.l.bf16 %v1594_v37 }
0x1f16   :  { %v1342_v58 = vmul.f32 %v1596_v40, %v1839_v2  ;;  %v1341_v43 = vmul.f32 %v1595_v41, %v1835_v61 }
0x1f18   :  { %v1350_v24 = vsel %vm79_vm1, %v1342_v58, 0.0  ;;  %v1343_v18 = vsel %vm79_vm1, %v1341_v43, 0.0 }
0x1f19   :  { %v1351_v45 = vrot.slane %v1350_v24, 4  ;;  %v1344_v54 = vrot.slane %v1343_v18, 4 }
0x1f1b   :  { %v1352_v46 = vadd.f32 %v1351_v45, %v1350_v24  ;;  %v1345_v47 = vadd.f32 %v1344_v54, %v1343_v18 }
0x1f1d   :  { %v1353_v48 = vrot.slane %v1352_v46, 2  ;;  %v1346_v42 = vrot.slane %v1345_v47, 2 }
0x1f1f   :  { %v1354_v49 = vadd.f32 %v1353_v48, %v1352_v46  ;;  %v1347_v50 = vadd.f32 %v1346_v42, %v1345_v47  ;;  %v1433_v51 = vpop.permute.xlu1 %1432 }
0x1f20   :  { %v1421_v15 = vpop.permute.xlu0 %1420 }
0x1f21   :  { %v1355_v0 = vrot.slane %v1354_v49, 1  ;;  %v1348_v38 = vrot.slane %v1347_v50, 1  ;;  %v1425_v1 = vperm.slane %v1421_v15, %v1843_v7 }
0x1f23   :  { %v1356_v36 = vadd.f32 %v1355_v0, %v1354_v49  ;;  %v1349_v53 = vadd.f32 %v1348_v38, %v1347_v50  ;;  %v1427_v31 = vsel %vm300_vm6, %v1426_v25, %v1425_v1 }
0x1f25   :  { %v1534_v32 = vadd.f32 -0.125, %v1356_v36  ;;  %v1533_v2 = vadd.f32 -0.125, %v1349_v53 }
0x1f27   :  { %v1359_v61 = vadd.f32 %v1533_v2, %v2096_v57  ;;  %v1360_v55 = vadd.f32 %v1534_v32, %v2098_v5  ;;  %v1446_v52 = vpop.permute.xlu1 %1445  ;;  %v1437_v57 = vadd.s32 4294967288, %v1843_v7  ;;  %v1450_v5 = vadd.s32 4294967280, %v1843_v7 }
0x1f28   :  { %v1436_v60 = vpop.permute.xlu0 %1435 }
0x1f29   :  { %v1363_v56 = vsel %vm300_vm6, %v1360_v55, %v1359_v61  ;;  %v1439_v9 = vperm.slane %v1436_v60, %v1437_v57  ;;  %v1438_v62 = vperm.slane %v1433_v51, %v1437_v57  ;;  %v1451_v12 = vperm.slane %v1446_v52, %v1450_v5 }
0x1f2a   :  { %1535 = vmatmul.msk.f32.vlgmr.msra.gmra.mxu2 %vm79_vm1, %v1363_v56 }
0x1f2b   :  { %v1440_v13 = vsel %vm300_vm6, %v1439_v9, %v1438_v62 }
0x1f2c   :  { %v1472_v20 = vsel %vm355_vm9, %v1427_v31, %v1440_v13 }
0x1f2f   :  { %v1395_v17 = vpop.permute.xlu1 %1394 }
0x1f30   :  { %v1449_v33 = vpop.permute.xlu0 %1448 }
0x1f31   :  { %v1452_v23 = vperm.slane %v1449_v33, %v1450_v5 }
0x1f33   :  { %v1453_v22 = vsel %vm300_vm6, %v1452_v23, %v1451_v12 }
0x1f34   :  { %v1473_v29 = vsel %vm79_vm1, %v1472_v20, %v1453_v22 }
0x1f37   :  { %v1470_v14 = vpop.permute.xlu1 %1469 }
0x1fad   :  { %v1383_v63 = vpop.f32.mrf.mxu2 }
0x1fae   :  { %1387 = vrot.lane.b32.xlu0 %v1383_v63, %s1749_s23 }
0x1fb6   :  { %1461 = vperm.xlu0 %1598, %v1412_v6  }
0x2020   :  { %v1388_v16 = vpop.permute.xlu0 %1387 }
0x2021   :  { %v1390_v10 = vadd.f32 %v2059_v39, %v1388_v16 }
0x2023   :  { %v1397_v26 = vadd.f32 %v1395_v17, %v1390_v10 }
0x2025   :  { %v1414_v34 = vmul.f32 %v2150_v27, %v1397_v26 }
0x2028   :  { %v1462_v28 = vpop.permute.xlu0 %1461 }
0x2029   :  { %v1465_v39 = vperm.slane %v1462_v28, %v1463_v30 }
0x202b   :  { %v1466_v19 = vsel %vm300_vm6, %v1465_v39, %v1464_v35 }
0x202c   :  { %v1475_v7 = vsel %vm1474_vm12, %v1473_v29, %v1466_v19 }
0x202d   :  { %v1476_v8 = vsel %vm103_vm0, %v1475_v7, %v1414_v34 }
0x202e   :  { %v1478_v59 = vsel %vm1477_vm13, %v1476_v8, %v1470_v14 }
0x202f   :  { %v1480_v44 = vsel %vm1479_vm14, %v1478_v59, 0.0 }
0x2030   :  { %1481 = vst [vmem:[#allocation7] sm:$0x3] %v1480_v44 }
0x2031   :  { %1492 = dma.vmem_to_hbm [thread:$0]  %s1488_s25, 32, %s1490_s28, [#allocation4]  }
0x2032   :  { %1732 = dma.done.wait [#allocation4], 32  }
0x2033   :  { %1733 = vsyncadd [#allocation4], 4294967264 }
0x2034   :  { %1497 = vsyncpa [#allocation3], 1 }
0x2035   :  { %1498 = vsyncpa [#allocation6], 1 }
0x2036   :  { %1499 = vsyncpa [#allocation4], 1 }

</bundles_post_ra>
